<compile_context>
chip_gen: v5e
topology: v5e:2x2
jax: 0.10.0
libtpu: 0.0.40
codegen_flags: <defaults>
</compile_context>

<pallas_src>
import math
import functools

import jax
import jax.numpy as jnp
from jax.experimental import pallas as pl
from jax.experimental.pallas import tpu as pltpu


PAD = 4
BN_EPS = 1e-5


# ----------------------------------------------------------------------------
# Kernel 1: fused 3x3 conv (stride 1, pad 4) + bias + ReLU + BN affine
#           [+ optional fused 2x2/stride-2 max or avg pooling]
# ----------------------------------------------------------------------------
def conv_block_kernel(x_ref, w_ref, b_ref, s_ref, t_ref, o_ref,
                      xp_ref, acc_ref, *, pool, pad):
    # x_ref  : (1, H, W, Cin)        un-padded input for this batch element
    # w_ref  : (9, Cin, Cout)        3x3 taps flattened on the leading axis
    # b_ref/s_ref/t_ref : (1, Cout)  conv bias, BN scale, BN shift
    # o_ref  : (1, Hout, Wout, Cout)
    # xp_ref : VMEM scratch (Hp*Wp + 8, Cin) -- zero-padded image, flattened rows
    # acc_ref: VMEM scratch (Ho*Wp, Cout)    -- f32 conv accumulator
    H, W, Cin = x_ref.shape[1], x_ref.shape[2], x_ref.shape[3]
    Cout = o_ref.shape[3]
    Hp, Wp = H + 2 * pad, W + 2 * pad
    Ho, Wo = Hp - 2, Wp - 2                     # conv output spatial (= H + 6)
    M = Ho * Wp

    # Build the zero-padded image in VMEM (no jnp.pad / HBM round-trip).
    xp_ref[...] = jnp.zeros_like(xp_ref)
    for h in range(H):                           # static unroll, H <= 16 here
        base = (pad + h) * Wp + pad
        xp_ref[base:base + W, :] = x_ref[0, h, :, :]

    # Whole-image per-tap GEMMs: rows r = ho*Wp + wo (wo over-computed to Wp;
    # the garbage columns wo in [Wo, Wp) are sliced away below).  Row offsets
    # never exceed Hp*Wp + 2, which is inside the (+8)-padded scratch.
    acc_ref[...] = jnp.zeros_like(acc_ref)
    for dy in range(3):
        for dx in range(3):
            off = dy * Wp + dx
            acc_ref[...] += jnp.dot(xp_ref[off:off + M, :],
                                    w_ref[3 * dy + dx],
                                    preferred_element_type=jnp.float32)

    y = jnp.maximum(acc_ref[...] + b_ref[...], 0.0)   # bias + ReLU
    y = y * s_ref[...] + t_ref[...]                   # BN (eval-mode affine)
    y = y.reshape(Ho, Wp, Cout)

    if pool is None:
        o_ref[0] = y[:, :Wo, :]
    else:
        Po, Qo = Ho // 2, Wo // 2                     # floor, like PyTorch pooling
        y = y[:2 * Po, :2 * Qo, :]
        y = y.reshape(Po, 2, 2 * Qo, Cout)            # pair rows
        if pool == "max":
            y = jnp.maximum(y[:, 0], y[:, 1])
        else:
            y = y[:, 0] + y[:, 1]
        y = y.reshape(Po, Qo, 2, Cout)                # pair columns
        if pool == "max":
            y = jnp.maximum(y[:, :, 0, :], y[:, :, 1, :])
        else:
            y = (y[:, :, 0, :] + y[:, :, 1, :]) * 0.25
        o_ref[0] = y


def conv3x3_relu_bn(x_nhwc, w, b, bn_scale, bn_shift, pool=None):
    N, H, W, Cin = x_nhwc.shape
    Cout = w.shape[-1]
    Hp, Wp = H + 2 * PAD, W + 2 * PAD
    Ho, Wo = Hp - 2, Wp - 2
    if pool is None:
        Hout, Wout = Ho, Wo
    else:
        Hout, Wout = Ho // 2, Wo // 2
    w9 = w.reshape(9, Cin, Cout)
    kern = functools.partial(conv_block_kernel, pool=pool, pad=PAD)
    return pl.pallas_call(
        kern,
        out_shape=jax.ShapeDtypeStruct((N, Hout, Wout, Cout), jnp.float32),
        grid=(N,),
        in_specs=[
            pl.BlockSpec((1, H, W, Cin), lambda n: (n, 0, 0, 0)),
            pl.BlockSpec((9, Cin, Cout), lambda n: (0, 0, 0)),
            pl.BlockSpec((1, Cout), lambda n: (0, 0)),
            pl.BlockSpec((1, Cout), lambda n: (0, 0)),
            pl.BlockSpec((1, Cout), lambda n: (0, 0)),
        ],
        out_specs=pl.BlockSpec((1, Hout, Wout, Cout), lambda n: (n, 0, 0, 0)),
        scratch_shapes=[
            pltpu.VMEM((Hp * Wp + 8, Cin), jnp.float32),   # padded image
            pltpu.VMEM((Ho * Wp, Cout), jnp.float32),      # conv accumulator
        ],
        compiler_params=pltpu.CompilerParams(dimension_semantics=("parallel",)),
    )(x_nhwc, w9, b.reshape(1, Cout), bn_scale.reshape(1, Cout),
      bn_shift.reshape(1, Cout))


# ----------------------------------------------------------------------------
# Kernel 2: fused FC head
#   fc_1 (K-tiled, bf16 weight stream, f32 accumulate) + bias
#   + Softmax(dim=1) + BatchNorm1d affine + Dropout(eval=id) + fc_2
# ----------------------------------------------------------------------------
def head_kernel(x_ref, w1_ref, b1_ref, s_ref, t_ref, w2_ref, b2_ref,
                o_ref, acc_ref):
    k = pl.program_id(0)

    @pl.when(k == 0)
    def _():
        acc_ref[...] = jnp.zeros_like(acc_ref)

    # bf16 x bf16 matmul on the MXU, f32 accumulation in VMEM scratch.
    acc_ref[...] += jnp.dot(x_ref[...].astype(jnp.bfloat16), w1_ref[...],
                            preferred_element_type=jnp.float32)

    @pl.when(k == pl.num_programs(0) - 1)
    def _():
        y = acc_ref[...] + b1_ref[...]                       # fc_1 bias  (B, 1024)
        m = jnp.max(y, axis=1, keepdims=True)
        e = jnp.exp(y - m)
        p = e / jnp.sum(e, axis=1, keepdims=True)            # softmax over features
        h = p * s_ref[...] + t_ref[...]                      # BatchNorm1d (eval)
        # dropout_1: eval-mode -> identity
        o_ref[...] = (jnp.dot(h, w2_ref[...],
                              preferred_element_type=jnp.float32)
                      + b2_ref[...])                         # fc_2


def _pick_tk(K, target=5120):
    """Largest divisor of K that is a multiple of 128 and <= target."""
    start = min(K, target)
    start -= start % 128
    for cand in range(start, 0, -128):
        if K % cand == 0:
            return cand
    return K          # tiny / awkward K: single block


def fc_head(x, w1_bf16, b1, bn_scale, bn_shift, w2, b2):
    B, K = x.shape
    N1 = w1_bf16.shape[1]
    Nc = w2.shape[1]
    tk = _pick_tk(K)
    return pl.pallas_call(
        head_kernel,
        out_shape=jax.ShapeDtypeStruct((B, Nc), jnp.float32),
        grid=(K // tk,),
        in_specs=[
            pl.BlockSpec((B, tk), lambda k: (0, k)),
            pl.BlockSpec((tk, N1), lambda k: (k, 0)),
            pl.BlockSpec((1, N1), lambda k: (0, 0)),
            pl.BlockSpec((1, N1), lambda k: (0, 0)),
            pl.BlockSpec((1, N1), lambda k: (0, 0)),
            pl.BlockSpec((N1, Nc), lambda k: (0, 0)),
            pl.BlockSpec((1, Nc), lambda k: (0, 0)),
        ],
        out_specs=pl.BlockSpec((B, Nc), lambda k: (0, 0)),
        scratch_shapes=[pltpu.VMEM((B, N1), jnp.float32)],
        compiler_params=pltpu.CompilerParams(
            dimension_semantics=("arbitrary",),
            # 2 x (tk,1024) bf16 buffers (~20 MiB) + fc_2 weight + acc; 48 MiB
            # leaves headroom even on v7x (64 MiB physical VMEM).
            vmem_limit_bytes=48 * 1024 * 1024),
    )(x, w1_bf16, b1.reshape(1, N1), bn_scale.reshape(1, N1),
      bn_shift.reshape(1, N1), w2, b2.reshape(1, Nc))


# ----------------------------------------------------------------------------
# Deterministic parameter construction
# ----------------------------------------------------------------------------
def make_conv_block(key, cin, cout):
    k1, k2, k3, k4, k5, k6 = jax.random.split(key, 6)
    fan_in, fan_out = cin * 9, cout * 9
    limit = math.sqrt(6.0 / (fan_in + fan_out))            # xavier_uniform
    w = jax.random.uniform(k1, (3, 3, cin, cout), jnp.float32, -limit, limit)
    bb = 1.0 / math.sqrt(fan_in)
    b = jax.random.uniform(k2, (cout,), jnp.float32, -bb, bb)
    gamma = jax.random.uniform(k3, (cout,), jnp.float32, 0.5, 1.5)
    beta = 0.1 * jax.random.normal(k4, (cout,), jnp.float32)
    rmean = 0.1 * jax.random.normal(k5, (cout,), jnp.float32)
    rvar = jax.random.uniform(k6, (cout,), jnp.float32, 0.5, 1.5)
    scale = gamma / jnp.sqrt(rvar + BN_EPS)
    shift = beta - rmean * scale
    return dict(w=w, b=b, bn_scale=scale, bn_shift=shift)


def make_linear(key, k_in, n_out):
    k1, k2 = jax.random.split(key)
    lim = 1.0 / math.sqrt(k_in)
    w = jax.random.uniform(k1, (k_in, n_out), jnp.float32, -lim, lim)
    b = jax.random.uniform(k2, (n_out,), jnp.float32, -lim, lim)
    return w, b


def make_fc1(key, c, h, w, n_out):
    """fc_1 weight: built in PyTorch NCHW-flatten row order, then permuted once
    to NHWC (h, w, c) row order so the runtime flatten needs no transpose.
    Stored in bf16 (streamed weight); accumulation stays f32 in-kernel."""
    k_in = c * h * w
    w_nchw, b = make_linear(key, k_in, n_out)
    w_nhwc = (w_nchw.reshape(c, h, w, n_out)
                    .transpose(1, 2, 0, 3)
                    .reshape(k_in, n_out))
    return w_nhwc.astype(jnp.bfloat16), b


def make_bn1d(key, n):
    k1, k2, k3, k4 = jax.random.split(key, 4)
    gamma = jax.random.uniform(k1, (n,), jnp.float32, 0.5, 1.5)
    beta = 0.1 * jax.random.normal(k2, (n,), jnp.float32)
    rmean = 0.1 * jax.random.normal(k3, (n,), jnp.float32)
    rvar = jax.random.uniform(k4, (n,), jnp.float32, 0.5, 1.5)
    scale = gamma / jnp.sqrt(rvar + BN_EPS)
    shift = beta - rmean * scale
    return scale, shift


# ----------------------------------------------------------------------------
# Full forward pass (mirrors ModelT4.forward)
# ----------------------------------------------------------------------------
def model_t4_forward(x_nchw, params):
    y = jnp.transpose(x_nchw, (0, 2, 3, 1))                   # NCHW -> NHWC
    y = conv3x3_relu_bn(y, **params["c1"])                    # conv_1/relu/bn
    y = conv3x3_relu_bn(y, **params["c2"], pool="max")        # conv_2/relu/bn + pool_2
    y = conv3x3_relu_bn(y, **params["c3"], pool="avg")        # conv_3/relu/bn + pool_3
    y = conv3x3_relu_bn(y, **params["c4"])                    # conv_4/relu/bn
    y = conv3x3_relu_bn(y, **params["c5"])                    # conv_5/relu/bn
    # pool5 is NOT applied in the PyTorch forward() -> skipped here as well.
    y = y.reshape(y.shape[0], -1)          # NHWC flatten (fc_1 rows pre-permuted)
    w1, b1 = params["fc1"]
    s6, t6 = params["bn6"]
    w2, b2 = params["fc2"]
    # fc_1 + softmax + bn_6 + dropout(eval) + fc_2, all in one kernel
    return fc_head(y, w1, b1, s6, t6, w2, b2)


if __name__ == "__main__":
    key = jax.random.PRNGKey(0)
    ks = jax.random.split(key, 10)

    N, Cin, H, W = 2, 3, 8, 8            # small, consistent with the module
    n_classes = 200

    # spatial trace of the forward pass for an HxW input
    h = H + 6          # conv_1
    h = h + 6          # conv_2
    h = h // 2         # pool_2
    h = h + 6          # conv_3
    h = h // 2         # pool_3
    h = h + 6          # conv_4
    h = h + 6          # conv_5  -> final spatial (pool5 unused)

    params = {
        "c1": make_conv_block(ks[0], 3, 128),
        "c2": make_conv_block(ks[1], 128, 256),
        "c3": make_conv_block(ks[2], 256, 256),
        "c4": make_conv_block(ks[3], 256, 128),
        "c5": make_conv_block(ks[4], 128, 128),
        "fc1": make_fc1(ks[5], 128, h, h, 1024),
        "bn6": make_bn1d(ks[6], 1024),
        "fc2": make_linear(ks[7], 1024, n_classes),
    }

    x = jax.random.normal(ks[8], (N, Cin, H, W), jnp.float32)   # NCHW input

    out = model_t4_forward(x, params)
    out = jax.block_until_ready(out)
    assert out.shape == (N, n_classes) and out.dtype == jnp.float32
    assert bool(jnp.all(jnp.isfinite(out)))
    print("KERNEL_OK")
</pallas_src>

<mosaic_0001>
module attributes {stable_mosaic.version = 11 : i64} {
  func.func @conv_block_kernel(%arg0: i32, %arg1: memref<1x8x8x3xf32, #tpu.memory_space<vmem>>, %arg2: memref<9x3x128xf32, #tpu.memory_space<vmem>>, %arg3: memref<1x128xf32, #tpu.memory_space<vmem>>, %arg4: memref<1x128xf32, #tpu.memory_space<vmem>>, %arg5: memref<1x128xf32, #tpu.memory_space<vmem>>, %arg6: memref<1x14x14x128xf32, #tpu.memory_space<vmem>>, %arg7: memref<264x3xf32, #tpu.memory_space<vmem>>, %arg8: memref<224x128xf32, #tpu.memory_space<vmem>>) attributes {dimension_semantics = [#tpu.dimension_semantics<parallel>], iteration_bounds = array<i64: 2>, scalar_prefetch = 0 : i64, scratch_operands = 2 : i64, tpu.core_type = #tpu.core_type<tc>, window_params = [{transform_indices = @transform_0, window_bounds = array<i64: 1, 8, 8, 3>}, {pipeline_mode = #tpu.pipeline_mode<synchronous>, transform_indices = @transform_1, window_bounds = array<i64: 9, 3, 128>}, {pipeline_mode = #tpu.pipeline_mode<synchronous>, transform_indices = @transform_2, window_bounds = array<i64: 1, 128>}, {pipeline_mode = #tpu.pipeline_mode<synchronous>, transform_indices = @transform_3, window_bounds = array<i64: 1, 128>}, {pipeline_mode = #tpu.pipeline_mode<synchronous>, transform_indices = @transform_4, window_bounds = array<i64: 1, 128>}, {transform_indices = @transform_5, window_bounds = array<i64: 1, 14, 14, 128>}]} {
    %cst = arith.constant 0.000000e+00 : f32
    %0 = vector.broadcast %cst : f32 to vector<264x3xf32>
    %c0 = arith.constant 0 : index
    %c0_0 = arith.constant 0 : index
    %1 = vector.load %arg7[%c0, %c0_0] : memref<264x3xf32, #tpu.memory_space<vmem>>, vector<264x3xf32>
    tpu.vector_store %arg7[%c0, %c0_0], %0 {strides = array<i32>} : memref<264x3xf32, #tpu.memory_space<vmem>>, vector<264x3xf32>,
    %c0_1 = arith.constant 0 : index
    %c0_2 = arith.constant 0 : index
    %c0_3 = arith.constant 0 : index
    %c0_4 = arith.constant 0 : index
    %2 = vector.load %arg1[%c0_1, %c0_2, %c0_3, %c0_4] : memref<1x8x8x3xf32, #tpu.memory_space<vmem>>, vector<1x1x8x3xf32>
    %3 = vector.shape_cast %2 : vector<1x1x8x3xf32> to vector<8x3xf32>
    %c68 = arith.constant 68 : index
    %c0_5 = arith.constant 0 : index
    %4 = vector.load %arg7[%c68, %c0_5] : memref<264x3xf32, #tpu.memory_space<vmem>>, vector<8x3xf32>
    tpu.vector_store %arg7[%c68, %c0_5], %3 {strides = array<i32>} : memref<264x3xf32, #tpu.memory_space<vmem>>, vector<8x3xf32>,
    %c0_6 = arith.constant 0 : index
    %c1 = arith.constant 1 : index
    %c0_7 = arith.constant 0 : index
    %c0_8 = arith.constant 0 : index
    %5 = vector.load %arg1[%c0_6, %c1, %c0_7, %c0_8] : memref<1x8x8x3xf32, #tpu.memory_space<vmem>>, vector<1x1x8x3xf32>
    %6 = vector.shape_cast %5 : vector<1x1x8x3xf32> to vector<8x3xf32>
    %c84 = arith.constant 84 : index
    %c0_9 = arith.constant 0 : index
    %7 = vector.load %arg7[%c84, %c0_9] : memref<264x3xf32, #tpu.memory_space<vmem>>, vector<8x3xf32>
    tpu.vector_store %arg7[%c84, %c0_9], %6 {strides = array<i32>} : memref<264x3xf32, #tpu.memory_space<vmem>>, vector<8x3xf32>,
    %c0_10 = arith.constant 0 : index
    %c2 = arith.constant 2 : index
    %c0_11 = arith.constant 0 : index
    %c0_12 = arith.constant 0 : index
    %8 = vector.load %arg1[%c0_10, %c2, %c0_11, %c0_12] : memref<1x8x8x3xf32, #tpu.memory_space<vmem>>, vector<1x1x8x3xf32>
    %9 = vector.shape_cast %8 : vector<1x1x8x3xf32> to vector<8x3xf32>
    %c100 = arith.constant 100 : index
    %c0_13 = arith.constant 0 : index
    %10 = vector.load %arg7[%c100, %c0_13] : memref<264x3xf32, #tpu.memory_space<vmem>>, vector<8x3xf32>
    tpu.vector_store %arg7[%c100, %c0_13], %9 {strides = array<i32>} : memref<264x3xf32, #tpu.memory_space<vmem>>, vector<8x3xf32>,
    %c0_14 = arith.constant 0 : index
    %c3 = arith.constant 3 : index
    %c0_15 = arith.constant 0 : index
    %c0_16 = arith.constant 0 : index
    %11 = vector.load %arg1[%c0_14, %c3, %c0_15, %c0_16] : memref<1x8x8x3xf32, #tpu.memory_space<vmem>>, vector<1x1x8x3xf32>
    %12 = vector.shape_cast %11 : vector<1x1x8x3xf32> to vector<8x3xf32>
    %c116 = arith.constant 116 : index
    %c0_17 = arith.constant 0 : index
    %13 = vector.load %arg7[%c116, %c0_17] : memref<264x3xf32, #tpu.memory_space<vmem>>, vector<8x3xf32>
    tpu.vector_store %arg7[%c116, %c0_17], %12 {strides = array<i32>} : memref<264x3xf32, #tpu.memory_space<vmem>>, vector<8x3xf32>,
    %c0_18 = arith.constant 0 : index
    %c4 = arith.constant 4 : index
    %c0_19 = arith.constant 0 : index
    %c0_20 = arith.constant 0 : index
    %14 = vector.load %arg1[%c0_18, %c4, %c0_19, %c0_20] : memref<1x8x8x3xf32, #tpu.memory_space<vmem>>, vector<1x1x8x3xf32>
    %15 = vector.shape_cast %14 : vector<1x1x8x3xf32> to vector<8x3xf32>
    %c132 = arith.constant 132 : index
    %c0_21 = arith.constant 0 : index
    %16 = vector.load %arg7[%c132, %c0_21] : memref<264x3xf32, #tpu.memory_space<vmem>>, vector<8x3xf32>
    tpu.vector_store %arg7[%c132, %c0_21], %15 {strides = array<i32>} : memref<264x3xf32, #tpu.memory_space<vmem>>, vector<8x3xf32>,
    %c0_22 = arith.constant 0 : index
    %c5 = arith.constant 5 : index
    %c0_23 = arith.constant 0 : index
    %c0_24 = arith.constant 0 : index
    %17 = vector.load %arg1[%c0_22, %c5, %c0_23, %c0_24] : memref<1x8x8x3xf32, #tpu.memory_space<vmem>>, vector<1x1x8x3xf32>
    %18 = vector.shape_cast %17 : vector<1x1x8x3xf32> to vector<8x3xf32>
    %c148 = arith.constant 148 : index
    %c0_25 = arith.constant 0 : index
    %19 = vector.load %arg7[%c148, %c0_25] : memref<264x3xf32, #tpu.memory_space<vmem>>, vector<8x3xf32>
    tpu.vector_store %arg7[%c148, %c0_25], %18 {strides = array<i32>} : memref<264x3xf32, #tpu.memory_space<vmem>>, vector<8x3xf32>,
    %c0_26 = arith.constant 0 : index
    %c6 = arith.constant 6 : index
    %c0_27 = arith.constant 0 : index
    %c0_28 = arith.constant 0 : index
    %20 = vector.load %arg1[%c0_26, %c6, %c0_27, %c0_28] : memref<1x8x8x3xf32, #tpu.memory_space<vmem>>, vector<1x1x8x3xf32>
    %21 = vector.shape_cast %20 : vector<1x1x8x3xf32> to vector<8x3xf32>
    %c164 = arith.constant 164 : index
    %c0_29 = arith.constant 0 : index
    %22 = vector.load %arg7[%c164, %c0_29] : memref<264x3xf32, #tpu.memory_space<vmem>>, vector<8x3xf32>
    tpu.vector_store %arg7[%c164, %c0_29], %21 {strides = array<i32>} : memref<264x3xf32, #tpu.memory_space<vmem>>, vector<8x3xf32>,
    %c0_30 = arith.constant 0 : index
    %c7 = arith.constant 7 : index
    %c0_31 = arith.constant 0 : index
    %c0_32 = arith.constant 0 : index
    %23 = vector.load %arg1[%c0_30, %c7, %c0_31, %c0_32] : memref<1x8x8x3xf32, #tpu.memory_space<vmem>>, vector<1x1x8x3xf32>
    %24 = vector.shape_cast %23 : vector<1x1x8x3xf32> to vector<8x3xf32>
    %c180 = arith.constant 180 : index
    %c0_33 = arith.constant 0 : index
    %25 = vector.load %arg7[%c180, %c0_33] : memref<264x3xf32, #tpu.memory_space<vmem>>, vector<8x3xf32>
    tpu.vector_store %arg7[%c180, %c0_33], %24 {strides = array<i32>} : memref<264x3xf32, #tpu.memory_space<vmem>>, vector<8x3xf32>,
    %cst_34 = arith.constant 0.000000e+00 : f32
    %26 = vector.broadcast %cst_34 : f32 to vector<224x128xf32>
    %c0_35 = arith.constant 0 : index
    %c0_36 = arith.constant 0 : index
    %27 = vector.load %arg8[%c0_35, %c0_36] : memref<224x128xf32, #tpu.memory_space<vmem>>, vector<224x128xf32>
    tpu.vector_store %arg8[%c0_35, %c0_36], %26 {strides = array<i32>} : memref<224x128xf32, #tpu.memory_space<vmem>>, vector<224x128xf32>,
    %c0_37 = arith.constant 0 : index
    %c0_38 = arith.constant 0 : index
    %28 = vector.load %arg8[%c0_37, %c0_38] : memref<224x128xf32, #tpu.memory_space<vmem>>, vector<224x128xf32>
    %c0_39 = arith.constant 0 : index
    %c0_40 = arith.constant 0 : index
    %29 = vector.load %arg7[%c0_39, %c0_40] : memref<264x3xf32, #tpu.memory_space<vmem>>, vector<224x3xf32>
    %c0_41 = arith.constant 0 : index
    %c0_42 = arith.constant 0 : index
    %c0_43 = arith.constant 0 : index
    %30 = vector.load %arg2[%c0_41, %c0_42, %c0_43] : memref<9x3x128xf32, #tpu.memory_space<vmem>>, vector<1x3x128xf32>
    %31 = vector.shape_cast %30 : vector<1x3x128xf32> to vector<3x128xf32>
    %cst_44 = arith.constant dense<0.000000e+00> : vector<224x128xf32>
    %32 = tpu.matmul %29, %31, %cst_44 {dimension_numbers = #tpu.dot_dimension_numbers<[1], [0], [0], [1], [0, 0, 1, 1], [], []>} : vector<224x3xf32>, vector<3x128xf32>, vector<224x128xf32> -> vector<224x128xf32>
    %33 = arith.addf %28, %32 : vector<224x128xf32>
    %c0_45 = arith.constant 0 : index
    %c0_46 = arith.constant 0 : index
    %34 = vector.load %arg8[%c0_45, %c0_46] : memref<224x128xf32, #tpu.memory_space<vmem>>, vector<224x128xf32>
    tpu.vector_store %arg8[%c0_45, %c0_46], %33 {strides = array<i32>} : memref<224x128xf32, #tpu.memory_space<vmem>>, vector<224x128xf32>,
    %c0_47 = arith.constant 0 : index
    %c0_48 = arith.constant 0 : index
    %35 = vector.load %arg8[%c0_47, %c0_48] : memref<224x128xf32, #tpu.memory_space<vmem>>, vector<224x128xf32>
    %c1_49 = arith.constant 1 : index
    %c0_50 = arith.constant 0 : index
    %36 = vector.load %arg7[%c1_49, %c0_50] : memref<264x3xf32, #tpu.memory_space<vmem>>, vector<224x3xf32>
    %c1_51 = arith.constant 1 : index
    %c0_52 = arith.constant 0 : index
    %c0_53 = arith.constant 0 : index
    %37 = vector.load %arg2[%c1_51, %c0_52, %c0_53] : memref<9x3x128xf32, #tpu.memory_space<vmem>>, vector<1x3x128xf32>
    %38 = vector.shape_cast %37 : vector<1x3x128xf32> to vector<3x128xf32>
    %cst_54 = arith.constant dense<0.000000e+00> : vector<224x128xf32>
    %39 = tpu.matmul %36, %38, %cst_54 {dimension_numbers = #tpu.dot_dimension_numbers<[1], [0], [0], [1], [0, 0, 1, 1], [], []>} : vector<224x3xf32>, vector<3x128xf32>, vector<224x128xf32> -> vector<224x128xf32>
    %40 = arith.addf %35, %39 : vector<224x128xf32>
    %c0_55 = arith.constant 0 : index
    %c0_56 = arith.constant 0 : index
    %41 = vector.load %arg8[%c0_55, %c0_56] : memref<224x128xf32, #tpu.memory_space<vmem>>, vector<224x128xf32>
    tpu.vector_store %arg8[%c0_55, %c0_56], %40 {strides = array<i32>} : memref<224x128xf32, #tpu.memory_space<vmem>>, vector<224x128xf32>,
    %c0_57 = arith.constant 0 : index
    %c0_58 = arith.constant 0 : index
    %42 = vector.load %arg8[%c0_57, %c0_58] : memref<224x128xf32, #tpu.memory_space<vmem>>, vector<224x128xf32>
    %c2_59 = arith.constant 2 : index
    %c0_60 = arith.constant 0 : index
    %43 = vector.load %arg7[%c2_59, %c0_60] : memref<264x3xf32, #tpu.memory_space<vmem>>, vector<224x3xf32>
    %c2_61 = arith.constant 2 : index
    %c0_62 = arith.constant 0 : index
    %c0_63 = arith.constant 0 : index
    %44 = vector.load %arg2[%c2_61, %c0_62, %c0_63] : memref<9x3x128xf32, #tpu.memory_space<vmem>>, vector<1x3x128xf32>
    %45 = vector.shape_cast %44 : vector<1x3x128xf32> to vector<3x128xf32>
    %cst_64 = arith.constant dense<0.000000e+00> : vector<224x128xf32>
    %46 = tpu.matmul %43, %45, %cst_64 {dimension_numbers = #tpu.dot_dimension_numbers<[1], [0], [0], [1], [0, 0, 1, 1], [], []>} : vector<224x3xf32>, vector<3x128xf32>, vector<224x128xf32> -> vector<224x128xf32>
    %47 = arith.addf %42, %46 : vector<224x128xf32>
    %c0_65 = arith.constant 0 : index
    %c0_66 = arith.constant 0 : index
    %48 = vector.load %arg8[%c0_65, %c0_66] : memref<224x128xf32, #tpu.memory_space<vmem>>, vector<224x128xf32>
    tpu.vector_store %arg8[%c0_65, %c0_66], %47 {strides = array<i32>} : memref<224x128xf32, #tpu.memory_space<vmem>>, vector<224x128xf32>,
    %c0_67 = arith.constant 0 : index
    %c0_68 = arith.constant 0 : index
    %49 = vector.load %arg8[%c0_67, %c0_68] : memref<224x128xf32, #tpu.memory_space<vmem>>, vector<224x128xf32>
    %c16 = arith.constant 16 : index
    %c0_69 = arith.constant 0 : index
    %50 = vector.load %arg7[%c16, %c0_69] : memref<264x3xf32, #tpu.memory_space<vmem>>, vector<224x3xf32>
    %c3_70 = arith.constant 3 : index
    %c0_71 = arith.constant 0 : index
    %c0_72 = arith.constant 0 : index
    %51 = vector.load %arg2[%c3_70, %c0_71, %c0_72] : memref<9x3x128xf32, #tpu.memory_space<vmem>>, vector<1x3x128xf32>
    %52 = vector.shape_cast %51 : vector<1x3x128xf32> to vector<3x128xf32>
    %cst_73 = arith.constant dense<0.000000e+00> : vector<224x128xf32>
    %53 = tpu.matmul %50, %52, %cst_73 {dimension_numbers = #tpu.dot_dimension_numbers<[1], [0], [0], [1], [0, 0, 1, 1], [], []>} : vector<224x3xf32>, vector<3x128xf32>, vector<224x128xf32> -> vector<224x128xf32>
    %54 = arith.addf %49, %53 : vector<224x128xf32>
    %c0_74 = arith.constant 0 : index
    %c0_75 = arith.constant 0 : index
    %55 = vector.load %arg8[%c0_74, %c0_75] : memref<224x128xf32, #tpu.memory_space<vmem>>, vector<224x128xf32>
    tpu.vector_store %arg8[%c0_74, %c0_75], %54 {strides = array<i32>} : memref<224x128xf32, #tpu.memory_space<vmem>>, vector<224x128xf32>,
    %c0_76 = arith.constant 0 : index
    %c0_77 = arith.constant 0 : index
    %56 = vector.load %arg8[%c0_76, %c0_77] : memref<224x128xf32, #tpu.memory_space<vmem>>, vector<224x128xf32>
    %c17 = arith.constant 17 : index
    %c0_78 = arith.constant 0 : index
    %57 = vector.load %arg7[%c17, %c0_78] : memref<264x3xf32, #tpu.memory_space<vmem>>, vector<224x3xf32>
    %c4_79 = arith.constant 4 : index
    %c0_80 = arith.constant 0 : index
    %c0_81 = arith.constant 0 : index
    %58 = vector.load %arg2[%c4_79, %c0_80, %c0_81] : memref<9x3x128xf32, #tpu.memory_space<vmem>>, vector<1x3x128xf32>
    %59 = vector.shape_cast %58 : vector<1x3x128xf32> to vector<3x128xf32>
    %cst_82 = arith.constant dense<0.000000e+00> : vector<224x128xf32>
    %60 = tpu.matmul %57, %59, %cst_82 {dimension_numbers = #tpu.dot_dimension_numbers<[1], [0], [0], [1], [0, 0, 1, 1], [], []>} : vector<224x3xf32>, vector<3x128xf32>, vector<224x128xf32> -> vector<224x128xf32>
    %61 = arith.addf %56, %60 : vector<224x128xf32>
    %c0_83 = arith.constant 0 : index
    %c0_84 = arith.constant 0 : index
    %62 = vector.load %arg8[%c0_83, %c0_84] : memref<224x128xf32, #tpu.memory_space<vmem>>, vector<224x128xf32>
    tpu.vector_store %arg8[%c0_83, %c0_84], %61 {strides = array<i32>} : memref<224x128xf32, #tpu.memory_space<vmem>>, vector<224x128xf32>,
    %c0_85 = arith.constant 0 : index
    %c0_86 = arith.constant 0 : index
    %63 = vector.load %arg8[%c0_85, %c0_86] : memref<224x128xf32, #tpu.memory_space<vmem>>, vector<224x128xf32>
    %c18 = arith.constant 18 : index
    %c0_87 = arith.constant 0 : index
    %64 = vector.load %arg7[%c18, %c0_87] : memref<264x3xf32, #tpu.memory_space<vmem>>, vector<224x3xf32>
    %c5_88 = arith.constant 5 : index
    %c0_89 = arith.constant 0 : index
    %c0_90 = arith.constant 0 : index
    %65 = vector.load %arg2[%c5_88, %c0_89, %c0_90] : memref<9x3x128xf32, #tpu.memory_space<vmem>>, vector<1x3x128xf32>
    %66 = vector.shape_cast %65 : vector<1x3x128xf32> to vector<3x128xf32>
    %cst_91 = arith.constant dense<0.000000e+00> : vector<224x128xf32>
    %67 = tpu.matmul %64, %66, %cst_91 {dimension_numbers = #tpu.dot_dimension_numbers<[1], [0], [0], [1], [0, 0, 1, 1], [], []>} : vector<224x3xf32>, vector<3x128xf32>, vector<224x128xf32> -> vector<224x128xf32>
    %68 = arith.addf %63, %67 : vector<224x128xf32>
    %c0_92 = arith.constant 0 : index
    %c0_93 = arith.constant 0 : index
    %69 = vector.load %arg8[%c0_92, %c0_93] : memref<224x128xf32, #tpu.memory_space<vmem>>, vector<224x128xf32>
    tpu.vector_store %arg8[%c0_92, %c0_93], %68 {strides = array<i32>} : memref<224x128xf32, #tpu.memory_space<vmem>>, vector<224x128xf32>,
    %c0_94 = arith.constant 0 : index
    %c0_95 = arith.constant 0 : index
    %70 = vector.load %arg8[%c0_94, %c0_95] : memref<224x128xf32, #tpu.memory_space<vmem>>, vector<224x128xf32>
    %c32 = arith.constant 32 : index
    %c0_96 = arith.constant 0 : index
    %71 = vector.load %arg7[%c32, %c0_96] : memref<264x3xf32, #tpu.memory_space<vmem>>, vector<224x3xf32>
    %c6_97 = arith.constant 6 : index
    %c0_98 = arith.constant 0 : index
    %c0_99 = arith.constant 0 : index
    %72 = vector.load %arg2[%c6_97, %c0_98, %c0_99] : memref<9x3x128xf32, #tpu.memory_space<vmem>>, vector<1x3x128xf32>
    %73 = vector.shape_cast %72 : vector<1x3x128xf32> to vector<3x128xf32>
    %cst_100 = arith.constant dense<0.000000e+00> : vector<224x128xf32>
    %74 = tpu.matmul %71, %73, %cst_100 {dimension_numbers = #tpu.dot_dimension_numbers<[1], [0], [0], [1], [0, 0, 1, 1], [], []>} : vector<224x3xf32>, vector<3x128xf32>, vector<224x128xf32> -> vector<224x128xf32>
    %75 = arith.addf %70, %74 : vector<224x128xf32>
    %c0_101 = arith.constant 0 : index
    %c0_102 = arith.constant 0 : index
    %76 = vector.load %arg8[%c0_101, %c0_102] : memref<224x128xf32, #tpu.memory_space<vmem>>, vector<224x128xf32>
    tpu.vector_store %arg8[%c0_101, %c0_102], %75 {strides = array<i32>} : memref<224x128xf32, #tpu.memory_space<vmem>>, vector<224x128xf32>,
    %c0_103 = arith.constant 0 : index
    %c0_104 = arith.constant 0 : index
    %77 = vector.load %arg8[%c0_103, %c0_104] : memref<224x128xf32, #tpu.memory_space<vmem>>, vector<224x128xf32>
    %c33 = arith.constant 33 : index
    %c0_105 = arith.constant 0 : index
    %78 = vector.load %arg7[%c33, %c0_105] : memref<264x3xf32, #tpu.memory_space<vmem>>, vector<224x3xf32>
    %c7_106 = arith.constant 7 : index
    %c0_107 = arith.constant 0 : index
    %c0_108 = arith.constant 0 : index
    %79 = vector.load %arg2[%c7_106, %c0_107, %c0_108] : memref<9x3x128xf32, #tpu.memory_space<vmem>>, vector<1x3x128xf32>
    %80 = vector.shape_cast %79 : vector<1x3x128xf32> to vector<3x128xf32>
    %cst_109 = arith.constant dense<0.000000e+00> : vector<224x128xf32>
    %81 = tpu.matmul %78, %80, %cst_109 {dimension_numbers = #tpu.dot_dimension_numbers<[1], [0], [0], [1], [0, 0, 1, 1], [], []>} : vector<224x3xf32>, vector<3x128xf32>, vector<224x128xf32> -> vector<224x128xf32>
    %82 = arith.addf %77, %81 : vector<224x128xf32>
    %c0_110 = arith.constant 0 : index
    %c0_111 = arith.constant 0 : index
    %83 = vector.load %arg8[%c0_110, %c0_111] : memref<224x128xf32, #tpu.memory_space<vmem>>, vector<224x128xf32>
    tpu.vector_store %arg8[%c0_110, %c0_111], %82 {strides = array<i32>} : memref<224x128xf32, #tpu.memory_space<vmem>>, vector<224x128xf32>,
    %c0_112 = arith.constant 0 : index
    %c0_113 = arith.constant 0 : index
    %84 = vector.load %arg8[%c0_112, %c0_113] : memref<224x128xf32, #tpu.memory_space<vmem>>, vector<224x128xf32>
    %c34 = arith.constant 34 : index
    %c0_114 = arith.constant 0 : index
    %85 = vector.load %arg7[%c34, %c0_114] : memref<264x3xf32, #tpu.memory_space<vmem>>, vector<224x3xf32>
    %c8 = arith.constant 8 : index
    %c0_115 = arith.constant 0 : index
    %c0_116 = arith.constant 0 : index
    %86 = vector.load %arg2[%c8, %c0_115, %c0_116] : memref<9x3x128xf32, #tpu.memory_space<vmem>>, vector<1x3x128xf32>
    %87 = vector.shape_cast %86 : vector<1x3x128xf32> to vector<3x128xf32>
    %cst_117 = arith.constant dense<0.000000e+00> : vector<224x128xf32>
    %88 = tpu.matmul %85, %87, %cst_117 {dimension_numbers = #tpu.dot_dimension_numbers<[1], [0], [0], [1], [0, 0, 1, 1], [], []>} : vector<224x3xf32>, vector<3x128xf32>, vector<224x128xf32> -> vector<224x128xf32>
    %89 = arith.addf %84, %88 : vector<224x128xf32>
    %c0_118 = arith.constant 0 : index
    %c0_119 = arith.constant 0 : index
    %90 = vector.load %arg8[%c0_118, %c0_119] : memref<224x128xf32, #tpu.memory_space<vmem>>, vector<224x128xf32>
    tpu.vector_store %arg8[%c0_118, %c0_119], %89 {strides = array<i32>} : memref<224x128xf32, #tpu.memory_space<vmem>>, vector<224x128xf32>,
    %c0_120 = arith.constant 0 : index
    %c0_121 = arith.constant 0 : index
    %91 = vector.load %arg8[%c0_120, %c0_121] : memref<224x128xf32, #tpu.memory_space<vmem>>, vector<224x128xf32>
    %c0_122 = arith.constant 0 : index
    %c0_123 = arith.constant 0 : index
    %92 = vector.load %arg3[%c0_122, %c0_123] : memref<1x128xf32, #tpu.memory_space<vmem>>, vector<1x128xf32>
    %93 = vector.broadcast %92 : vector<1x128xf32> to vector<224x128xf32>
    %94 = arith.addf %91, %93 : vector<224x128xf32>
    %cst_124 = arith.constant 0.000000e+00 : f32
    %95 = vector.broadcast %cst_124 : f32 to vector<224x128xf32>
    %96 = arith.maximumf %94, %95 : vector<224x128xf32>
    %c0_125 = arith.constant 0 : index
    %c0_126 = arith.constant 0 : index
    %97 = vector.load %arg4[%c0_125, %c0_126] : memref<1x128xf32, #tpu.memory_space<vmem>>, vector<1x128xf32>
    %98 = vector.broadcast %97 : vector<1x128xf32> to vector<224x128xf32>
    %99 = arith.mulf %96, %98 : vector<224x128xf32>
    %c0_127 = arith.constant 0 : index
    %c0_128 = arith.constant 0 : index
    %100 = vector.load %arg5[%c0_127, %c0_128] : memref<1x128xf32, #tpu.memory_space<vmem>>, vector<1x128xf32>
    %101 = vector.broadcast %100 : vector<1x128xf32> to vector<224x128xf32>
    %102 = arith.addf %99, %101 : vector<224x128xf32>
    %103 = vector.shape_cast %102 : vector<224x128xf32> to vector<14x16x128xf32>
    %104 = vector.extract_strided_slice %103 {offsets = [0, 0, 0], sizes = [14, 14, 128], strides = [1, 1, 1]} : vector<14x16x128xf32> to vector<14x14x128xf32>
    %c0_129 = arith.constant 0 : index
    %c0_130 = arith.constant 0 : index
    %c0_131 = arith.constant 0 : index
    %c0_132 = arith.constant 0 : index
    %105 = vector.load %arg6[%c0_129, %c0_130, %c0_131, %c0_132] : memref<1x14x14x128xf32, #tpu.memory_space<vmem>>, vector<1x14x14x128xf32>
    %106 = vector.shape_cast %105 : vector<1x14x14x128xf32> to vector<14x14x128xf32>
    %107 = vector.shape_cast %104 : vector<14x14x128xf32> to vector<1x14x14x128xf32>
    tpu.vector_store %arg6[%c0_129, %c0_130, %c0_131, %c0_132], %107 {strides = array<i32>} : memref<1x14x14x128xf32, #tpu.memory_space<vmem>>, vector<1x14x14x128xf32>,
    return
  }
  func.func @transform_0(%arg0: i32) -> (i32, i32, i32, i32) {
    %c0_i32 = arith.constant 0 : i32
    %c0_i32_0 = arith.constant 0 : i32
    %c0_i32_1 = arith.constant 0 : i32
    %c0_i32_2 = arith.constant 0 : i32
    return %arg0, %c0_i32, %c0_i32_0, %c0_i32_1 : i32, i32, i32, i32
  }
  func.func @transform_1(%arg0: i32) -> (i32, i32, i32) {
    %c0_i32 = arith.constant 0 : i32
    %c0_i32_0 = arith.constant 0 : i32
    %c0_i32_1 = arith.constant 0 : i32
    %c0_i32_2 = arith.constant 0 : i32
    return %c0_i32, %c0_i32_0, %c0_i32_1 : i32, i32, i32
  }
  func.func @transform_2(%arg0: i32) -> (i32, i32) {
    %c0_i32 = arith.constant 0 : i32
    %c0_i32_0 = arith.constant 0 : i32
    %c0_i32_1 = arith.constant 0 : i32
    return %c0_i32, %c0_i32_0 : i32, i32
  }
  func.func @transform_3(%arg0: i32) -> (i32, i32) {
    %c0_i32 = arith.constant 0 : i32
    %c0_i32_0 = arith.constant 0 : i32
    %c0_i32_1 = arith.constant 0 : i32
    return %c0_i32, %c0_i32_0 : i32, i32
  }
  func.func @transform_4(%arg0: i32) -> (i32, i32) {
    %c0_i32 = arith.constant 0 : i32
    %c0_i32_0 = arith.constant 0 : i32
    %c0_i32_1 = arith.constant 0 : i32
    return %c0_i32, %c0_i32_0 : i32, i32
  }
  func.func @transform_5(%arg0: i32) -> (i32, i32, i32, i32) {
    %c0_i32 = arith.constant 0 : i32
    %c0_i32_0 = arith.constant 0 : i32
    %c0_i32_1 = arith.constant 0 : i32
    %c0_i32_2 = arith.constant 0 : i32
    return %arg0, %c0_i32, %c0_i32_0, %c0_i32_1 : i32, i32, i32, i32
  }
}

</mosaic_0001>

<bundles_post_ra>
// kernel: tpu_custom_call.1
= control target key start
LH: loop header
LB: loop body
LE: loop exit
PB: predicated region body
PF: predicated region fallthrough
CT: control target
= control target key end

     0   :  { %s3605_s18 = smov 0   ;;  %s4676_s0 = inlined_call_operand.vmem [shape: f32[2,8,8,3], index: 0, kind: input, shape index: {}]   ;;  %s4677_s1 = inlined_call_operand.vmem [shape: f32[9,3,128], index: 1, kind: input, shape index: {}]   ;;  %s4678_s2 = inlined_call_operand.vmem [shape: f32[1,128], index: 2, kind: input, shape index: {}]   ;;  %s4679_s3 = inlined_call_operand.vmem [shape: f32[1,128], index: 3, kind: input, shape index: {}]   ;;  %s4680_s4 = inlined_call_operand.vmem [shape: f32[1,128], index: 4, kind: input, shape index: {}]   ;;  %s4681_s5 = inlined_call_operand.vmem [shape: f32[2,14,14,128], index: 5, kind: output, shape index: {}]  }
   0x1 LB: > { %s3263_s19 = sadd.s32 4294967295, %s3572_s18   ;;  %p3267_p0 = scmp.ge.s32.totalorder %s3572_s18, 1  ;;  %s3572_s18 = sphi %s3605_s18, %s15_s18  }
   0x2   : > { %p187_p1 = scmp.lt.s32.totalorder %s3572_s18, 3 }
   0x4   : > { %p188_p2 = pnand %p3267_p0, %p187_p1 }
   0x6   : > { %191 = sbr.rel (%p188_p2) target bundleno = 696 (0x2b8), region = 40 }
   0xb   : > { %v366_v0 = vld [vmem:[%s4677_s1] sm:$0x7]  ;;  %vm451_vm0 = vcmask 1042432   ;;  %vm225_vm1 = vcmask 23552   ;;  %v3574_v1 = vmov 0.0   ;;  %p215_p3 = scmp.lt.s32.totalorder %s3263_s19, 1 }
   0xc   : > { %3550 = vmatpush.msk.msra.mxu1 %vm451_vm0, %v366_v0  ;;  %233 = vst.msk [vmem:[#allocation2 + $0x38] sm:$0xff] %vm225_vm1, %v3574_v1  ;;  %3551 = vmatpush.msk.msra.mxu2 %vm451_vm0, %v366_v0  ;;  %v3337_v3 = vld [vmem:[%s4677_s1 + $0x8] sm:$0x7]  ;;  %v3367_v4 = vld [vmem:[%s4677_s1 + $0xc] sm:$0x7] }
   0xd   : > { %226 = vst.msk [vmem:[#allocation2] sm:$0xff] %vm225_vm1, %v3574_v1  ;;  %3552 = vmatpush.msk.msra.mxu3 %vm451_vm0, %v366_v0  ;;  %3278 = vmatpush.msk.msra.mxu0 %vm451_vm0, %v366_v0  ;;  %v3307_v5 = vld [vmem:[%s4677_s1 + $0x4] sm:$0x7]  ;;  %v3397_v7 = vld [vmem:[%s4677_s1 + $0x10] sm:$0x7]  ;;  %s4790_s19 = smov (!%p215_p3, %s3263_s19), 1 }
   0xe   : > { %227 = vst.msk [vmem:[#allocation2 + $0x8] sm:$0xff] %vm225_vm1, %v3574_v1  ;;  %3338 = vmatpush.msk.msrb.mxu2 %vm451_vm0, %v3337_v3  ;;  %3308 = vmatpush.msk.msrb.mxu1 %vm451_vm0, %v3307_v5  ;;  %s3549_s30 = sshll.u32 %s4790_s19, 6  ;;  %v3457_v33 = vld [vmem:[%s4677_s1 + $0x18] sm:$0x7]  ;;  %v3487_v35 = vld [vmem:[%s4677_s1 + $0x1c] sm:$0x7] }
   0xf   : > { %228 = vst.msk [vmem:[#allocation2 + $0x10] sm:$0xff] %vm225_vm1, %v3574_v1  ;;  %3368 = vmatpush.msk.msrb.mxu3 %vm451_vm0, %v3367_v4  ;;  %3398 = vmatpush.msk.msrb.mxu0 %vm451_vm0, %v3397_v7  ;;  %s219_s8 = scalar_lea.vmem %s4676_s0, %s3549_s30  ;;  %v3427_v36 = vld [vmem:[%s4677_s1 + $0x14] sm:$0x7]  ;;  %v3517_v41 = vld [vmem:[%s4677_s1 + $0x20] sm:$0x7]  ;;  %s3553_s23 = smul.u32 224, %s4790_s19 }
  0x10   : > { %229 = vst.msk [vmem:[#allocation2 + $0x18] sm:$0xff] %vm225_vm1, %v3574_v1  ;;  %v3273_v9 = vld [vmem:[%s219_s8 + $0x18] sm:$0xff]  ;;  %v259_v10 = vld [vmem:[%s219_s8] sm:$0xff]  ;;  %v3276_v11 = vld [vmem:[%s219_s8 + $0x30] sm:$0xff] }
  0x11   : > { %230 = vst.msk [vmem:[#allocation2 + $0x20] sm:$0xff] %vm225_vm1, %v3574_v1  ;;  %v3277_v12 = vld [vmem:[%s219_s8 + $0x38] sm:$0xff]  ;;  %v3274_v14 = vld [vmem:[%s219_s8 + $0x20] sm:$0xff]  ;;  %v3271_v15 = vld [vmem:[%s219_s8 + $0x8] sm:$0xff]  ;;  %s4444_s28 = scalar_lea.vmem %s4681_s5, %s3553_s23 }
  0x12   : > { %231 = vst.msk [vmem:[#allocation2 + $0x28] sm:$0xff] %vm225_vm1, %v3574_v1  ;;  %v3275_v16 = vld [vmem:[%s219_s8 + $0x28] sm:$0xff]  ;;  %v3272_v17 = vld [vmem:[%s219_s8 + $0x10] sm:$0xff] }
  0x13   : > { %v3627_v2 = vld [vmem:[#allocation2 + $0x38] sm:$0xff]  ;;  %232 = vst.msk [vmem:[#allocation2 + $0x30] sm:$0xff] %vm225_vm1, %v3574_v1 }
  0x14   : > { %3286 = vmatmul.msk.f32.vlgmr.msra.gmra.mxu1 %vm225_vm1, %v3627_v2  ;;  %234 = vst.msk [vmem:[#allocation2 + $0x40] sm:$0xff] %vm225_vm1, %v3574_v1  ;;  %v338_v6 = vld [vmem:[#allocation2] sm:$0xff] }
  0x15   : > { %235 = vst.msk [vmem:[#allocation2 + $0x48] sm:$0xff] %vm225_vm1, %v3574_v1  ;;  %3279 = vmatmul.msk.f32.vlgmr.msra.gmra.mxu0 %vm225_vm1, %v338_v6  ;;  %v339_v8 = vld [vmem:[#allocation2 + $0x8] sm:$0xff]  ;;  %3428 = vmatpush.msk.msra.mxu1 %vm451_vm0, %v3427_v36 }
  0x16   : > { %236 = vst.msk [vmem:[#allocation2 + $0x50] sm:$0xff] %vm225_vm1, %v3574_v1  ;;  %v3686_v13 = vld [vmem:[#allocation2 + $0x10] sm:$0xff]  ;;  %3518 = vmatpush.msk.msra.mxu0 %vm451_vm0, %v3517_v41  ;;  %v640_v47 = vld [vmem:[#allocation2 + $0x1] sm:$0xff] }
  0x17   : > { %237 = vst.msk [vmem:[#allocation2 + $0x58] sm:$0xff] %vm225_vm1, %v3574_v1  ;;  %v3703_v20 = vld [vmem:[#allocation2 + $0x18] sm:$0xff]  ;;  %v942_v50 = vld [vmem:[#allocation2 + $0x2] sm:$0xff]  ;;  %v943_v53 = vld [vmem:[#allocation2 + $0xa] sm:$0xff] }
  0x18   : > { %238 = vst.msk [vmem:[#allocation2 + $0x60] sm:$0xff] %vm225_vm1, %v3574_v1  ;;  %v3721_v25 = vld [vmem:[#allocation2 + $0x20] sm:$0xff]  ;;  %v642_v40 = vld [vmem:[#allocation2 + $0x11] sm:$0xff]  ;;  %v641_v51 = vld [vmem:[#allocation2 + $0x9] sm:$0xff] }
  0x19   : > { %239 = vst.msk [vmem:[#allocation2 + $0x68] sm:$0xff] %vm225_vm1, %v3574_v1  ;;  %v3737_v29 = vld [vmem:[#allocation2 + $0x28] sm:$0xff]  ;;  %v643_v45 = vld [vmem:[#allocation2 + $0x19] sm:$0xff] }
  0x1a   : > { %240 = vst.msk [vmem:[#allocation2 + $0x70] sm:$0xff] %vm225_vm1, %v3574_v1  ;;  %v3756_v34 = vld [vmem:[#allocation2 + $0x30] sm:$0xff]  ;;  %v3809_v49 = vld [vmem:[#allocation2 + $0x21] sm:$0xff] }
  0x1b   : > { %241 = vst.msk [vmem:[#allocation2 + $0x78] sm:$0xff] %vm225_vm1, %v3574_v1  ;;  %v3817_v52 = vld [vmem:[#allocation2 + $0x29] sm:$0xff]  ;;  %v3825_v54 = vld [vmem:[#allocation2 + $0x31] sm:$0xff]  ;;  %v3836_v56 = vld [vmem:[#allocation2 + $0x39] sm:$0xff] }
  0x1c   : > { %242 = vst.msk [vmem:[#allocation2 + $0x80] sm:$0xff] %vm225_vm1, %v3574_v1  ;;  %v3832_v55 = vld [vmem:[#allocation2 + $0x12] sm:$0xff]  ;;  %v3843_v57 = vld [vmem:[#allocation2 + $0x1a] sm:$0xff]  ;;  %v3855_v59 = vld [vmem:[#allocation2 + $0x22] sm:$0xff] }
  0x1d   : > { %243 = vst.msk [vmem:[#allocation2 + $0x88] sm:$0xff] %vm225_vm1, %v3574_v1  ;;  %3280 = vmatmul.msk.f32.gmra.mxu0 %vm225_vm1, %v339_v8  ;;  %v3867_v61 = vld [vmem:[#allocation2 + $0x2a] sm:$0xff]  ;;  %v3879_v63 = vld [vmem:[#allocation2 + $0x32] sm:$0xff] }
  0x1e   : > { %244 = vst.msk [vmem:[#allocation2 + $0x90] sm:$0xff] %vm225_vm1, %v3574_v1 }
  0x1f   : > { %245 = vst.msk [vmem:[#allocation2 + $0x98] sm:$0xff] %vm225_vm1, %v3574_v1 }
  0x20   : > { %246 = vst.msk [vmem:[#allocation2 + $0xa0] sm:$0xff] %vm225_vm1, %v3574_v1 }
  0x21   : > { %247 = vst.msk [vmem:[#allocation2 + $0xa8] sm:$0xff] %vm225_vm1, %v3574_v1 }
  0x22   : > { %248 = vst.msk [vmem:[#allocation2 + $0xb0] sm:$0xff] %vm225_vm1, %v3574_v1 }
  0x23   : > { %249 = vst.msk [vmem:[#allocation2 + $0xb8] sm:$0xff] %vm225_vm1, %v3574_v1 }
  0x24   : > { %250 = vst.msk [vmem:[#allocation2 + $0xc0] sm:$0xff] %vm225_vm1, %v3574_v1 }
  0x25   : > { %251 = vst.msk [vmem:[#allocation2 + $0xc8] sm:$0xff] %vm225_vm1, %v3574_v1  ;;  %3281 = vmatmul.msk.f32.gmra.mxu0 %vm225_vm1, %v3686_v13 }
  0x26   : > { %252 = vst.msk [vmem:[#allocation2 + $0xd0] sm:$0xff] %vm225_vm1, %v3574_v1 }
  0x27   : > { %253 = vst.msk [vmem:[#allocation2 + $0xd8] sm:$0xff] %vm225_vm1, %v3574_v1 }
  0x28   : > { %254 = vst.msk [vmem:[#allocation2 + $0xe0] sm:$0xff] %vm225_vm1, %v3574_v1 }
  0x29   : > { %255 = vst.msk [vmem:[#allocation2 + $0xe8] sm:$0xff] %vm225_vm1, %v3574_v1 }
  0x2a   : > { %256 = vst.msk [vmem:[#allocation2 + $0xf0] sm:$0xff] %vm225_vm1, %v3574_v1 }
  0x2b   : > { %257 = vst.msk [vmem:[#allocation2 + $0xf8] sm:$0xff] %vm225_vm1, %v3574_v1  ;;  %v3749_v32 = vld [vmem:[#allocation2 + $0xc0] sm:$0xff] }
  0x2c   : > { %258 = vst.msk [vmem:[#allocation2 + $0x100] sm:$0xff] %vm225_vm1, %v3574_v1  ;;  %v3777_v39 = vld [vmem:[#allocation2 + $0xc8] sm:$0xff] }
  0x2d   : > { %269 = vst.msk [vmem:[#allocation2 + $0x74] sm:$0xff] %vm225_vm1, %v3273_v9  ;;  %3282 = vmatmul.msk.f32.gmra.mxu0 %vm225_vm1, %v3703_v20  ;;  %v3794_v44 = vld [vmem:[#allocation2 + $0xd0] sm:$0xff] }
  0x2e   : > { %260 = vst.msk [vmem:[#allocation2 + $0x44] sm:$0xff] %vm225_vm1, %v259_v10  ;;  %v3805_v48 = vld [vmem:[#allocation2 + $0xd8] sm:$0xff] }
  0x2f   : > { %278 = vst.msk [vmem:[#allocation2 + $0xa4] sm:$0xff] %vm225_vm1, %v3276_v11 }
  0x30   : > { %281 = vst.msk [vmem:[#allocation2 + $0xb4] sm:$0xff] %vm225_vm1, %v3277_v12 }
  0x31   : > { %272 = vst.msk [vmem:[#allocation2 + $0x84] sm:$0xff] %vm225_vm1, %v3274_v14 }
  0x32   : > { %263 = vst.msk [vmem:[#allocation2 + $0x54] sm:$0xff] %vm225_vm1, %v3271_v15 }
  0x33   : > { %275 = vst.msk [vmem:[#allocation2 + $0x94] sm:$0xff] %vm225_vm1, %v3275_v16 }
  0x34   : > { %v3696_v18 = vld [vmem:[#allocation2 + $0x70] sm:$0xff]  ;;  %266 = vst.msk [vmem:[#allocation2 + $0x64] sm:$0xff] %vm225_vm1, %v3272_v17  ;;  %v3713_v22 = vld [vmem:[#allocation2 + $0x78] sm:$0xff] }
  0x35   : > { %3293 = vmatmul.msk.f32.vlgmr.msra.gmra.mxu2 %vm225_vm1, %v3696_v18  ;;  %v3701_v19 = vld [vmem:[#allocation2 + $0x40] sm:$0xff]  ;;  %v3715_v23 = vld [vmem:[#allocation2 + $0x48] sm:$0xff]  ;;  %3283 = vmatmul.msk.f32.gmra.mxu0 %vm225_vm1, %v3721_v25  ;;  %v3931_v12 = vld [vmem:[#allocation2 + $0x71] sm:$0xff] }
  0x36   : > { %3287 = vmatmul.msk.f32.gmra.mxu1 %vm225_vm1, %v3701_v19  ;;  %v3707_v21 = vld [vmem:[#allocation2 + $0xa8] sm:$0xff]  ;;  %4709 = vst [vmem:[#allocation4_spill] sm:$0xff] %v3715_v23  ;;  %3458 = vmatpush.msk.msra.mxu2 %vm451_vm0, %v3457_v33  ;;  %v3803_v46 = vld [vmem:[#allocation2 + $0xa0] sm:$0xff] }
  0x37   : > { %3300 = vmatmul.msk.f32.vlgmr.msra.gmra.mxu3 %vm225_vm1, %v3707_v21  ;;  %v3717_v24 = vld [vmem:[#allocation2 + $0xb0] sm:$0xff]  ;;  %v3733_v28 = vld [vmem:[#allocation2 + $0xb8] sm:$0xff]  ;;  %v3847_v58 = vld [vmem:[#allocation2 + $0x41] sm:$0xff]  ;;  %4719 = vst [vmem:[#allocation14_spill] sm:$0xff] %v3931_v12 }
  0x38   : > { %v3729_v26 = vld [vmem:[#allocation2 + $0x80] sm:$0xff]  ;;  %v3745_v30 = vld [vmem:[#allocation2 + $0x88] sm:$0xff]  ;;  %3488 = vmatpush.msk.msra.mxu3 %vm451_vm0, %v3487_v35  ;;  %4713 = vst [vmem:[#allocation8_spill] sm:$0xff] %v3847_v58 }
  0x39   : > { %v3731_v27 = vld [vmem:[#allocation2 + $0x50] sm:$0xff]  ;;  %v3747_v31 = vld [vmem:[#allocation2 + $0x58] sm:$0xff]  ;;  %v3909_v6 = vld [vmem:[#allocation2 + $0x42] sm:$0xff] }
  0x3a   : > { %4710 = vst [vmem:[#allocation5_spill] sm:$0xff] %v3731_v27  ;;  %v3773_v37 = vld [vmem:[#allocation2 + $0x90] sm:$0xff]  ;;  %v3790_v42 = vld [vmem:[#allocation2 + $0x98] sm:$0xff] }
  0x3b   : > { %4711 = vst [vmem:[#allocation6_spill] sm:$0xff] %v3747_v31  ;;  %v3775_v38 = vld [vmem:[#allocation2 + $0x60] sm:$0xff]  ;;  %v3792_v43 = vld [vmem:[#allocation2 + $0x68] sm:$0xff]  ;;  %v3871_v62 = vld [vmem:[#allocation2 + $0x51] sm:$0xff] }
  0x3c   : > { %4712 = vst [vmem:[#allocation7_spill] sm:$0xff] %v3775_v38  ;;  %v3859_v60 = vld [vmem:[#allocation2 + $0x49] sm:$0xff]  ;;  %v3885_v1 = vld [vmem:[#allocation2 + $0x59] sm:$0xff]  ;;  %v3899_v4 = vld [vmem:[#allocation2 + $0x61] sm:$0xff] }
  0x3d   : > { %3294 = vmatmul.msk.f32.gmra.mxu2 %vm225_vm1, %v3713_v22  ;;  %3284 = vmatmul.msk.f32.gmra.mxu0 %vm225_vm1, %v3737_v29  ;;  %4714 = vst [vmem:[#allocation9_spill] sm:$0xff] %v3859_v60  ;;  %v3915_v8 = vld [vmem:[#allocation2 + $0x69] sm:$0xff]  ;;  %v3943_v15 = vld [vmem:[#allocation2 + $0x52] sm:$0xff]  ;;  %v3963_v36 = vld [vmem:[#allocation2 + $0x5a] sm:$0xff] }
  0x3e   : > { %3288 = vmatmul.msk.f32.gmra.mxu1 %vm225_vm1, %v3715_v23  ;;  %4715 = vst [vmem:[#allocation10_spill] sm:$0xff] %v3871_v62  ;;  %v3923_v9 = vld [vmem:[#allocation2 + $0x4a] sm:$0xff] }
  0x3f   : > { %3301 = vmatmul.msk.f32.gmra.mxu3 %vm225_vm1, %v3717_v24  ;;  %4716 = vst [vmem:[#allocation11_spill] sm:$0xff] %v3885_v1 }
  0x40   : > { %4717 = vst [vmem:[#allocation12_spill] sm:$0xff] %v3899_v4 }
  0x41   : > { %4718 = vst [vmem:[#allocation13_spill] sm:$0xff] %v3915_v8 }
  0x42   : > { %4723 = vst [vmem:[#allocation18_spill] sm:$0xff] %v3963_v36 }
  0x45   : > { %3295 = vmatmul.msk.f32.gmra.mxu2 %vm225_vm1, %v3729_v26  ;;  %3285 = vmatmul.msk.f32.gmra.mxu0 %vm225_vm1, %v3756_v34 }
  0x46   : > { %3289 = vmatmul.msk.f32.gmra.mxu1 %vm225_vm1, %v3731_v27 }
  0x47   : > { %3302 = vmatmul.msk.f32.gmra.mxu3 %vm225_vm1, %v3733_v28 }
  0x4d   : > { %3296 = vmatmul.msk.f32.gmra.mxu2 %vm225_vm1, %v3745_v30  ;;  %3399 = vmatmul.msk.f32.vlgmr.msrb.gmra.mxu0 %vm225_vm1, %v642_v40 }
  0x4e   : > { %3290 = vmatmul.msk.f32.gmra.mxu1 %vm225_vm1, %v3747_v31 }
  0x4f   : > { %3303 = vmatmul.msk.f32.gmra.mxu3 %vm225_vm1, %v3749_v32 }
  0x55   : > { %3297 = vmatmul.msk.f32.gmra.mxu2 %vm225_vm1, %v3773_v37  ;;  %3400 = vmatmul.msk.f32.gmra.mxu0 %vm225_vm1, %v643_v45 }
  0x56   : > { %3291 = vmatmul.msk.f32.gmra.mxu1 %vm225_vm1, %v3775_v38 }
  0x57   : > { %3304 = vmatmul.msk.f32.gmra.mxu3 %vm225_vm1, %v3777_v39 }
  0x5d   : > { %3298 = vmatmul.msk.f32.gmra.mxu2 %vm225_vm1, %v3790_v42  ;;  %3401 = vmatmul.msk.f32.gmra.mxu0 %vm225_vm1, %v3809_v49 }
  0x5e   : > { %3292 = vmatmul.msk.f32.gmra.mxu1 %vm225_vm1, %v3792_v43 }
  0x5f   : > { %3305 = vmatmul.msk.f32.gmra.mxu3 %vm225_vm1, %v3794_v44 }
  0x65   : > { %3299 = vmatmul.msk.f32.gmra.mxu2 %vm225_vm1, %v3803_v46  ;;  %3402 = vmatmul.msk.f32.gmra.mxu0 %vm225_vm1, %v3817_v52 }
  0x66   : > { %3309 = vmatmul.msk.f32.vlgmr.msrb.gmra.mxu1 %vm225_vm1, %v640_v47 }
  0x67   : > { %3306 = vmatmul.msk.f32.gmra.mxu3 %vm225_vm1, %v3805_v48 }
  0x6d   : > { %3339 = vmatmul.msk.f32.vlgmr.msrb.gmra.mxu2 %vm225_vm1, %v942_v50  ;;  %3403 = vmatmul.msk.f32.gmra.mxu0 %vm225_vm1, %v3825_v54 }
  0x6e   : > { %3310 = vmatmul.msk.f32.gmra.mxu1 %vm225_vm1, %v641_v51  ;;  %v3983_v51 = vld [vmem:[#allocation2 + $0x62] sm:$0xff] }
  0x6f   : > { %3369 = vmatmul.msk.f32.vlgmr.msrb.gmra.mxu3 %vm225_vm1, %v3686_v13  ;;  %4726 = vst [vmem:[#allocation21_spill] sm:$0xff] %v3983_v51 }
  0x75   : > { %3340 = vmatmul.msk.f32.gmra.mxu2 %vm225_vm1, %v943_v53  ;;  %3404 = vmatmul.msk.f32.gmra.mxu0 %vm225_vm1, %v3836_v56 }
  0x76   : > { %3311 = vmatmul.msk.f32.gmra.mxu1 %vm225_vm1, %v642_v40 }
  0x77   : > { %3370 = vmatmul.msk.f32.gmra.mxu3 %vm225_vm1, %v3703_v20  ;;  %v3951_v20 = vld [vmem:[#allocation2 + $0x79] sm:$0xff] }
  0x78   : > { %4721 = vst [vmem:[#allocation16_spill] sm:$0xff] %v3951_v20 }
  0x7d   : > { %3341 = vmatmul.msk.f32.gmra.mxu2 %vm225_vm1, %v3832_v55  ;;  %3405 = vmatmul.msk.f32.gmra.mxu0 %vm225_vm1, %v3847_v58 }
  0x7e   : > { %3312 = vmatmul.msk.f32.gmra.mxu1 %vm225_vm1, %v643_v45  ;;  %v3971_v45 = vld [vmem:[#allocation2 + $0x81] sm:$0xff] }
  0x7f   : > { %3371 = vmatmul.msk.f32.gmra.mxu3 %vm225_vm1, %v3721_v25  ;;  %4724 = vst [vmem:[#allocation19_spill] sm:$0xff] %v3971_v45 }
  0x85   : > { %3342 = vmatmul.msk.f32.gmra.mxu2 %vm225_vm1, %v3843_v57  ;;  %3406 = vmatmul.msk.f32.gmra.mxu0 %vm225_vm1, %v3859_v60 }
  0x86   : > { %3313 = vmatmul.msk.f32.gmra.mxu1 %vm225_vm1, %v3809_v49 }
  0x87   : > { %3372 = vmatmul.msk.f32.gmra.mxu3 %vm225_vm1, %v3737_v29 }
  0x8d   : > { %3343 = vmatmul.msk.f32.gmra.mxu2 %vm225_vm1, %v3855_v59  ;;  %3407 = vmatmul.msk.f32.gmra.mxu0 %vm225_vm1, %v3871_v62 }
  0x8e   : > { %3314 = vmatmul.msk.f32.gmra.mxu1 %vm225_vm1, %v3817_v52 }
  0x8f   : > { %3373 = vmatmul.msk.f32.gmra.mxu3 %vm225_vm1, %v3756_v34 }
  0x91   : > { %v3907_v5 = vpop.f32.mrf.mxu1 }
  0x92   : > { %v3881_v0 = vpop.f32.mrf.mxu0 }
  0x95   : > { %3344 = vmatmul.msk.f32.gmra.mxu2 %vm225_vm1, %v3867_v61  ;;  %3408 = vmatmul.msk.f32.gmra.mxu0 %vm225_vm1, %v3885_v1 }
  0x96   : > { %3315 = vmatmul.msk.f32.gmra.mxu1 %vm225_vm1, %v3825_v54 }
  0x97   : > { %3374 = vmatmul.msk.f32.gmra.mxu3 %vm225_vm1, %v3627_v2  ;;  %v3893_v2 = vld [vmem:[#allocation2 + $0x3a] sm:$0xff] }
  0x9a   : > { %v3895_v3 = vpop.f32.mrf.mxu0 }
  0x9d   : > { %3345 = vmatmul.msk.f32.gmra.mxu2 %vm225_vm1, %v3879_v63  ;;  %3409 = vmatmul.msk.f32.gmra.mxu0 %vm225_vm1, %v3899_v4 }
  0x9e   : > { %3316 = vmatmul.msk.f32.gmra.mxu1 %vm225_vm1, %v3836_v56 }
  0x9f   : > { %3375 = vmatmul.msk.f32.gmra.mxu3 %vm225_vm1, %v3701_v19 }
  0xa2   : > { %v3911_v7 = vpop.f32.mrf.mxu0 }
  0xa5   : > { %3346 = vmatmul.msk.f32.gmra.mxu2 %vm225_vm1, %v3893_v2  ;;  %3410 = vmatmul.msk.f32.gmra.mxu0 %vm225_vm1, %v3915_v8 }
  0xa6   : > { %3317 = vmatmul.msk.f32.gmra.mxu1 %vm225_vm1, %v3847_v58 }
  0xa7   : > { %3376 = vmatmul.msk.f32.gmra.mxu3 %vm225_vm1, %v3715_v23 }
  0xaa   : > { %v3927_v11 = vpop.f32.mrf.mxu0 }
  0xad   : > { %3347 = vmatmul.msk.f32.gmra.mxu2 %vm225_vm1, %v3909_v6  ;;  %3411 = vmatmul.msk.f32.gmra.mxu0 %vm225_vm1, %v3931_v12 }
  0xae   : > { %3318 = vmatmul.msk.f32.gmra.mxu1 %vm225_vm1, %v3859_v60 }
  0xaf   : > { %3377 = vmatmul.msk.f32.gmra.mxu3 %vm225_vm1, %v3731_v27  ;;  %v4027_v27 = vld [vmem:[#allocation2 + $0x99] sm:$0xff] }
  0xb2   : > { %v3947_v17 = vpop.f32.mrf.mxu0 }
  0xb3   : > { %v3925_v10 = vpop.f32.mrf.mxu1 }
  0xb5   : > { %3348 = vmatmul.msk.f32.gmra.mxu2 %vm225_vm1, %v3923_v9  ;;  %3412 = vmatmul.msk.f32.gmra.mxu0 %vm225_vm1, %v3951_v20 }
  0xb6   : > { %3319 = vmatmul.msk.f32.gmra.mxu1 %vm225_vm1, %v3871_v62 }
  0xb7   : > { %3378 = vmatmul.msk.f32.gmra.mxu3 %vm225_vm1, %v3747_v31  ;;  %v4009_v31 = vld [vmem:[#allocation2 + $0x91] sm:$0xff] }
  0xb8   : > { %v3939_v13 = vpop.f32.mrf.mxu2 }
  0xba   : > { %v3941_v14 = vpop.f32.mrf.mxu3  ;;  %v3967_v41 = vpop.f32.mrf.mxu0 }
  0xbb   : > { %4720 = vst [vmem:[#allocation15_spill] sm:$0xff] %v3941_v14  ;;  %v3945_v16 = vpop.f32.mrf.mxu1  ;;  %v3991_v14 = vld [vmem:[#allocation2 + $0x89] sm:$0xff] }
  0xbd   : > { %3349 = vmatmul.msk.f32.gmra.mxu2 %vm225_vm1, %v3943_v15  ;;  %3413 = vmatmul.msk.f32.gmra.mxu0 %vm225_vm1, %v3971_v45 }
  0xbe   : > { %3320 = vmatmul.msk.f32.gmra.mxu1 %vm225_vm1, %v3885_v1 }
  0xbf   : > { %3379 = vmatmul.msk.f32.gmra.mxu3 %vm225_vm1, %v3775_v38 }
  0xc0   : > { %v3959_v33 = vpop.f32.mrf.mxu2 }
  0xc2   : > { %v3961_v35 = vpop.f32.mrf.mxu3 }
  0xc3   : > { %4722 = vst [vmem:[#allocation17_spill] sm:$0xff] %v3961_v35  ;;  %v3965_v40 = vpop.f32.mrf.mxu1  ;;  %v3987_v35 = vpop.f32.mrf.mxu0 }
  0xc5   : > { %3350 = vmatmul.msk.f32.gmra.mxu2 %vm225_vm1, %v3963_v36  ;;  %3414 = vmatmul.msk.f32.gmra.mxu0 %vm225_vm1, %v3991_v14 }
  0xc6   : > { %3321 = vmatmul.msk.f32.gmra.mxu1 %vm225_vm1, %v3899_v4  ;;  %v4003_v4 = vld [vmem:[#allocation2 + $0x6a] sm:$0xff] }
  0xc7   : > { %3380 = vmatmul.msk.f32.gmra.mxu3 %vm225_vm1, %v3792_v43  ;;  %4729 = vst [vmem:[#allocation24_spill] sm:$0xff] %v4003_v4 }
  0xc8   : > { %v3979_v47 = vpop.f32.mrf.mxu2 }
  0xca   : > { %v3981_v50 = vpop.f32.mrf.mxu3 }
  0xcb   : > { %4725 = vst [vmem:[#allocation20_spill] sm:$0xff] %v3981_v50  ;;  %v3985_v53 = vpop.f32.mrf.mxu1  ;;  %v1680_v1 = vpop.f32.mrf.mxu0 }
  0xcd   : > { %3351 = vmatmul.msk.f32.gmra.mxu2 %vm225_vm1, %v3983_v51  ;;  %3415 = vmatmul.msk.f32.gmra.mxu0 %vm225_vm1, %v4009_v31 }
  0xce   : > { %3322 = vmatmul.msk.f32.gmra.mxu1 %vm225_vm1, %v3915_v8  ;;  %v4021_v8 = vld [vmem:[#allocation2 + $0x72] sm:$0xff] }
  0xcf   : > { %3381 = vmatmul.msk.f32.gmra.mxu3 %vm225_vm1, %v3696_v18  ;;  %4732 = vst [vmem:[#allocation27_spill] sm:$0xff] %v4021_v8 }
  0xd0   : > { %v3999_v43 = vpop.f32.mrf.mxu2 }
  0xd1   : > { %4727 = vst [vmem:[#allocation22_spill] sm:$0xff] %v3999_v43  ;;  %v4068_v43 = vld [vmem:[#allocation2 + $0x8a] sm:$0xff] }
  0xd2   : > { %v4001_v50 = vpop.f32.mrf.mxu3 }
  0xd3   : > { %4728 = vst [vmem:[#allocation23_spill] sm:$0xff] %v4001_v50  ;;  %v4005_v38 = vpop.f32.mrf.mxu1 }
  0xd5   : > { %3352 = vmatmul.msk.f32.gmra.mxu2 %vm225_vm1, %v4003_v4  ;;  %v1683_v4 = vpop.f32.mrf.mxu0  ;;  %3416 = vmatmul.msk.f32.gmra.mxu0 %vm225_vm1, %v4027_v27 }
  0xd6   : > { %3323 = vmatmul.msk.f32.gmra.mxu1 %vm225_vm1, %v3931_v12  ;;  %v4039_v12 = vld [vmem:[#allocation2 + $0x7a] sm:$0xff] }
  0xd7   : > { %3382 = vmatmul.msk.f32.gmra.mxu3 %vm225_vm1, %v3713_v22  ;;  %4735 = vst [vmem:[#allocation30_spill] sm:$0xff] %v4039_v12 }
  0xd8   : > { %v4017_v18 = vpop.f32.mrf.mxu2 }
  0xd9   : > { %4730 = vst [vmem:[#allocation25_spill] sm:$0xff] %v4017_v18 }
  0xda   : > { %v4019_v50 = vpop.f32.mrf.mxu3 }
  0xdb   : > { %4731 = vst [vmem:[#allocation26_spill] sm:$0xff] %v4019_v50  ;;  %v4023_v62 = vpop.f32.mrf.mxu1 }
  0xdd   : > { %3353 = vmatmul.msk.f32.gmra.mxu2 %vm225_vm1, %v4021_v8  ;;  %v1686_v51 = vpop.f32.mrf.mxu0  ;;  %v4043_v8 = vld [vmem:[#allocation2 + $0xa1] sm:$0xff] }
  0xde   : > { %3324 = vmatmul.msk.f32.gmra.mxu1 %vm225_vm1, %v3951_v20  ;;  %3417 = vmatmul.msk.f32.gmra.mxu0 %vm225_vm1, %v4043_v8  ;;  %v4055_v20 = vld [vmem:[#allocation2 + $0x82] sm:$0xff] }
  0xdf   : > { %3383 = vmatmul.msk.f32.gmra.mxu3 %vm225_vm1, %v3729_v26  ;;  %4738 = vst [vmem:[#allocation33_spill] sm:$0xff] %v4055_v20 }
  0xe0   : > { %v4035_v22 = vpop.f32.mrf.mxu2 }
  0xe1   : > { %4733 = vst [vmem:[#allocation28_spill] sm:$0xff] %v4035_v22 }
  0xe2   : > { %v4037_v50 = vpop.f32.mrf.mxu3 }
  0xe3   : > { %4734 = vst [vmem:[#allocation29_spill] sm:$0xff] %v4037_v50  ;;  %v774_v18 = vpop.f32.mrf.mxu1 }
  0xe5   : > { %3354 = vmatmul.msk.f32.gmra.mxu2 %vm225_vm1, %v4039_v12  ;;  %v1689_v60 = vpop.f32.mrf.mxu0  ;;  %v4059_v12 = vld [vmem:[#allocation2 + $0xa9] sm:$0xff] }
  0xe6   : > { %3325 = vmatmul.msk.f32.gmra.mxu1 %vm225_vm1, %v3971_v45  ;;  %3418 = vmatmul.msk.f32.gmra.mxu0 %vm225_vm1, %v4059_v12 }
  0xe7   : > { %3384 = vmatmul.msk.f32.gmra.mxu3 %vm225_vm1, %v3745_v30  ;;  %v858_v30 = vadd.f32 %v774_v18, %v3881_v0  ;;  %v4074_v0 = vld [vmem:[#allocation2 + $0xb1] sm:$0xff] }
  0xe8   : > { %v4051_v26 = vpop.f32.mrf.mxu2 }
  0xe9   : > { %4736 = vst [vmem:[#allocation31_spill] sm:$0xff] %v4051_v26 }
  0xea   : > { %v4053_v50 = vpop.f32.mrf.mxu3 }
  0xeb   : > { %4737 = vst [vmem:[#allocation32_spill] sm:$0xff] %v4053_v50  ;;  %v777_v22 = vpop.f32.mrf.mxu1 }
  0xed   : > { %3355 = vmatmul.msk.f32.gmra.mxu2 %vm225_vm1, %v4055_v20  ;;  %v1692_v36 = vpop.f32.mrf.mxu0 }
  0xee   : > { %3326 = vmatmul.msk.f32.gmra.mxu1 %vm225_vm1, %v3991_v14  ;;  %3419 = vmatmul.msk.f32.gmra.mxu0 %vm225_vm1, %v4074_v0 }
  0xef   : > { %3385 = vmatmul.msk.f32.gmra.mxu3 %vm225_vm1, %v3773_v37  ;;  %v859_v37 = vadd.f32 %v777_v22, %v3895_v3  ;;  %v4089_v3 = vld [vmem:[#allocation2 + $0xb9] sm:$0xff] }
  0xf0   : > { %v1076_v50 = vpop.f32.mrf.mxu2 }
  0xf1   : > { %v1160_v45 = vadd.f32 %v1076_v50, %v858_v30 }
  0xf2   : > { %v1378_v26 = vpop.f32.mrf.mxu3 }
  0xf3   : > { %v1462_v23 = vadd.f32 %v1378_v26, %v1160_v45  ;;  %v780_v20 = vpop.f32.mrf.mxu1 }
  0xf5   : > { %v4070_v58 = vadd.f32 %v1680_v1, %v1462_v23  ;;  %3356 = vmatmul.msk.f32.gmra.mxu2 %vm225_vm1, %v4068_v43  ;;  %v4083_v1 = vld [vmem:[#allocation2 + $0x92] sm:$0xff]  ;;  %v1695_v30 = vpop.f32.mrf.mxu0 }
  0xf6   : > { %3327 = vmatmul.msk.f32.gmra.mxu1 %vm225_vm1, %v4009_v31  ;;  %3420 = vmatmul.msk.f32.gmra.mxu0 %vm225_vm1, %v4089_v3 }
  0xf7   : > { %4739 = vst [vmem:[#allocation34_spill] sm:$0xff] %v4070_v58  ;;  %3386 = vmatmul.msk.f32.gmra.mxu3 %vm225_vm1, %v3790_v42  ;;  %v860_v42 = vadd.f32 %v780_v20, %v3911_v7  ;;  %v4104_v7 = vld [vmem:[#allocation2 + $0xc1] sm:$0xff] }
  0xf8   : > { %v1079_v45 = vpop.f32.mrf.mxu2 }
  0xf9   : > { %v1161_v50 = vadd.f32 %v1079_v45, %v859_v37  ;;  %v4098_v45 = vld [vmem:[#allocation2 + $0x9a] sm:$0xff] }
  0xfa   : > { %v1381_v23 = vpop.f32.mrf.mxu3 }
  0xfb   : > { %v1463_v18 = vadd.f32 %v1381_v23, %v1161_v50  ;;  %v783_v26 = vpop.f32.mrf.mxu1 }
  0xfd   : > { %v4085_v58 = vadd.f32 %v1683_v4, %v1463_v18  ;;  %3357 = vmatmul.msk.f32.gmra.mxu2 %vm225_vm1, %v4083_v1  ;;  %v1698_v18 = vpop.f32.mrf.mxu0 }
  0xfe   : > { %3328 = vmatmul.msk.f32.gmra.mxu1 %vm225_vm1, %v4027_v27  ;;  %3421 = vmatmul.msk.f32.gmra.mxu0 %vm225_vm1, %v4104_v7 }
  0xff   : > { %4740 = vst [vmem:[#allocation35_spill] sm:$0xff] %v4085_v58  ;;  %3387 = vmatmul.msk.f32.gmra.mxu3 %vm225_vm1, %v3803_v46  ;;  %v861_v46 = vadd.f32 %v783_v26, %v3927_v11  ;;  %v4119_v11 = vld [vmem:[#allocation2 + $0xc9] sm:$0xff] }
 0x100   : > { %v1082_v22 = vpop.f32.mrf.mxu2 }
 0x101   : > { %v1162_v37 = vadd.f32 %v1082_v22, %v860_v42  ;;  %v4113_v22 = vld [vmem:[#allocation2 + $0xa2] sm:$0xff] }
 0x102   : > { %v1384_v4 = vpop.f32.mrf.mxu3 }
 0x103   : > { %v1464_v50 = vadd.f32 %v1384_v4, %v1162_v37  ;;  %v786_v23 = vpop.f32.mrf.mxu1 }
 0x105   : > { %v4100_v58 = vadd.f32 %v1686_v51, %v1464_v50  ;;  %3358 = vmatmul.msk.f32.gmra.mxu2 %vm225_vm1, %v4098_v45  ;;  %v1701_v50 = vpop.f32.mrf.mxu0 }
 0x106   : > { %3329 = vmatmul.msk.f32.gmra.mxu1 %vm225_vm1, %v4043_v8  ;;  %3422 = vmatmul.msk.f32.gmra.mxu0 %vm225_vm1, %v4119_v11 }
 0x107   : > { %4741 = vst [vmem:[#allocation36_spill] sm:$0xff] %v4100_v58  ;;  %3388 = vmatmul.msk.f32.gmra.mxu3 %vm225_vm1, %v3707_v21  ;;  %v862_v21 = vadd.f32 %v786_v23, %v3947_v17  ;;  %v4134_v17 = vld [vmem:[#allocation2 + $0xd1] sm:$0xff] }
 0x108   : > { %v1085_v20 = vpop.f32.mrf.mxu2 }
 0x109   : > { %v1163_v42 = vadd.f32 %v1085_v20, %v861_v46  ;;  %v4128_v20 = vld [vmem:[#allocation2 + $0xaa] sm:$0xff] }
 0x10a   : > { %v1387_v51 = vpop.f32.mrf.mxu3 }
 0x10b   : > { %v1465_v37 = vadd.f32 %v1387_v51, %v1163_v42  ;;  %v789_v4 = vpop.f32.mrf.mxu1 }
 0x10d   : > { %v4115_v58 = vadd.f32 %v1689_v60, %v1465_v37  ;;  %3359 = vmatmul.msk.f32.gmra.mxu2 %vm225_vm1, %v4113_v22  ;;  %v1704_v37 = vpop.f32.mrf.mxu0 }
 0x10e   : > { %3330 = vmatmul.msk.f32.gmra.mxu1 %vm225_vm1, %v4059_v12  ;;  %3423 = vmatmul.msk.f32.gmra.mxu0 %vm225_vm1, %v4134_v17 }
 0x10f   : > { %4742 = vst [vmem:[#allocation37_spill] sm:$0xff] %v4115_v58  ;;  %3389 = vmatmul.msk.f32.gmra.mxu3 %vm225_vm1, %v3717_v24  ;;  %v863_v24 = vadd.f32 %v789_v4, %v3967_v41  ;;  %v4149_v41 = vld [vmem:[#allocation2 + $0xd9] sm:$0xff] }
 0x110   : > { %v1088_v26 = vpop.f32.mrf.mxu2 }
 0x111   : > { %v1164_v46 = vadd.f32 %v1088_v26, %v862_v21  ;;  %v4143_v26 = vld [vmem:[#allocation2 + $0xb2] sm:$0xff] }
 0x112   : > { %v1390_v60 = vpop.f32.mrf.mxu3 }
 0x113   : > { %v1466_v42 = vadd.f32 %v1390_v60, %v1164_v46  ;;  %v792_v51 = vpop.f32.mrf.mxu1 }
 0x115   : > { %v4130_v58 = vadd.f32 %v1692_v36, %v1466_v42  ;;  %3360 = vmatmul.msk.f32.gmra.mxu2 %vm225_vm1, %v4128_v20  ;;  %v1707_v42 = vpop.f32.mrf.mxu0 }
 0x116   : > { %3331 = vmatmul.msk.f32.gmra.mxu1 %vm225_vm1, %v4074_v0  ;;  %3424 = vmatmul.msk.f32.gmra.mxu0 %vm225_vm1, %v4149_v41 }
 0x117   : > { %4743 = vst [vmem:[#allocation38_spill] sm:$0xff] %v4130_v58  ;;  %3390 = vmatmul.msk.f32.gmra.mxu3 %vm225_vm1, %v3733_v28  ;;  %v864_v28 = vadd.f32 %v792_v51, %v3987_v35 }
 0x118   : > { %v1091_v23 = vpop.f32.mrf.mxu2 }
 0x119   : > { %v1165_v21 = vadd.f32 %v1091_v23, %v863_v24  ;;  %v4158_v23 = vld [vmem:[#allocation2 + $0xba] sm:$0xff] }
 0x11a   : > { %v1393_v36 = vpop.f32.mrf.mxu3 }
 0x11b   : > { %v1467_v46 = vadd.f32 %v1393_v36, %v1165_v21  ;;  %v795_v60 = vpop.f32.mrf.mxu1 }
 0x11c   : > { %v865_v35 = vadd.f32 %v795_v60, %v3907_v5  ;;  %v4179_v5 = vld [vmem:[#allocation2 + $0xe9] sm:$0xff] }
 0x11d   : > { %v4145_v58 = vadd.f32 %v1695_v30, %v1467_v46  ;;  %3361 = vmatmul.msk.f32.gmra.mxu2 %vm225_vm1, %v4143_v26  ;;  %v1710_v46 = vpop.f32.mrf.mxu0  ;;  %4747 = vst [vmem:[#allocation42_spill] sm:$0xff] %v4179_v5 }
 0x11e   : > { %3332 = vmatmul.msk.f32.gmra.mxu1 %vm225_vm1, %v4089_v3 }
 0x11f   : > { %4744 = vst [vmem:[#allocation39_spill] sm:$0xff] %v4145_v58  ;;  %3391 = vmatmul.msk.f32.gmra.mxu3 %vm225_vm1, %v3749_v32  ;;  %v4166_v32 = vld [vmem:[#allocation2 + $0xe1] sm:$0xff] }
 0x120   : > { %v1094_v4 = vpop.f32.mrf.mxu2  ;;  %4746 = vst [vmem:[#allocation41_spill] sm:$0xff] %v4166_v32  ;;  %3425 = vmatmul.msk.f32.gmra.mxu0 %vm225_vm1, %v4166_v32 }
 0x121   : > { %v1166_v24 = vadd.f32 %v1094_v4, %v864_v28  ;;  %v4173_v4 = vld [vmem:[#allocation2 + $0xc2] sm:$0xff] }
 0x122   : > { %v1396_v30 = vpop.f32.mrf.mxu3 }
 0x123   : > { %v1468_v21 = vadd.f32 %v1396_v30, %v1166_v24  ;;  %v798_v36 = vpop.f32.mrf.mxu1 }
 0x125   : > { %v4160_v58 = vadd.f32 %v1698_v18, %v1468_v21  ;;  %3362 = vmatmul.msk.f32.gmra.mxu2 %vm225_vm1, %v4158_v23  ;;  %v1713_v21 = vpop.f32.mrf.mxu0 }
 0x126   : > { %3333 = vmatmul.msk.f32.gmra.mxu1 %vm225_vm1, %v4104_v7 }
 0x127   : > { %4745 = vst [vmem:[#allocation40_spill] sm:$0xff] %v4160_v58  ;;  %3392 = vmatmul.msk.f32.gmra.mxu3 %vm225_vm1, %v3777_v39  ;;  %v866_v39 = vadd.f32 %v798_v36, %v3925_v10 }
 0x128   : > { %v1097_v51 = vpop.f32.mrf.mxu2  ;;  %3426 = vmatmul.msk.f32.gmra.mxu0 %vm225_vm1, %v4179_v5 }
 0x129   : > { %v1167_v28 = vadd.f32 %v1097_v51, %v865_v35  ;;  %v4188_v51 = vld [vmem:[#allocation2 + $0xca] sm:$0xff] }
 0x12a   : > { %v1399_v18 = vpop.f32.mrf.mxu3 }
 0x12b   : > { %v1469_v24 = vadd.f32 %v1399_v18, %v1167_v28  ;;  %v801_v30 = vpop.f32.mrf.mxu1 }
 0x12d   : > { %v4175_v58 = vadd.f32 %v1701_v50, %v1469_v24  ;;  %3363 = vmatmul.msk.f32.gmra.mxu2 %vm225_vm1, %v4173_v4  ;;  %v1716_v24 = vpop.f32.mrf.mxu0 }
 0x12e   : > { %3334 = vmatmul.msk.f32.gmra.mxu1 %vm225_vm1, %v4119_v11 }
 0x12f   : > { %3393 = vmatmul.msk.f32.gmra.mxu3 %vm225_vm1, %v3794_v44  ;;  %v867_v44 = vadd.f32 %v801_v30, %v3945_v16 }
 0x130   : > { %v1100_v60 = vpop.f32.mrf.mxu2  ;;  %3519 = vmatmul.msk.f32.vlgmr.msra.gmra.mxu0 %vm225_vm1, %v3855_v59 }
 0x131   : > { %v1168_v35 = vadd.f32 %v1100_v60, %v866_v39  ;;  %v4201_v60 = vld [vmem:[#allocation2 + $0xd2] sm:$0xff] }
 0x132   : > { %v1402_v50 = vpop.f32.mrf.mxu3 }
 0x133   : > { %v1470_v28 = vadd.f32 %v1402_v50, %v1168_v35  ;;  %v804_v18 = vpop.f32.mrf.mxu1  ;;  %v4203_v50 = vld [vmem:[#allocation2 + $0xe0] sm:$0xff] }
 0x135   : > { %v4190_v32 = vadd.f32 %v1704_v37, %v1470_v28  ;;  %3364 = vmatmul.msk.f32.gmra.mxu2 %vm225_vm1, %v4188_v51  ;;  %v1719_v28 = vpop.f32.mrf.mxu0 }
 0x136   : > { %3335 = vmatmul.msk.f32.gmra.mxu1 %vm225_vm1, %v4134_v17 }
 0x137   : > { %3394 = vmatmul.msk.f32.gmra.mxu3 %vm225_vm1, %v3805_v48  ;;  %v868_v48 = vadd.f32 %v804_v18, %v3965_v40 }
 0x138   : > { %v1103_v10 = vpop.f32.mrf.mxu2  ;;  %3520 = vmatmul.msk.f32.gmra.mxu0 %vm225_vm1, %v3867_v61 }
 0x139   : > { %v1169_v36 = vadd.f32 %v1103_v10, %v867_v44  ;;  %v4216_v10 = vld [vmem:[#allocation2 + $0xda] sm:$0xff] }
 0x13a   : > { %v1405_v39 = vpop.f32.mrf.mxu3 }
 0x13b   : > { %v1471_v37 = vadd.f32 %v1405_v39, %v1169_v36  ;;  %v807_v35 = vpop.f32.mrf.mxu1  ;;  %v4218_v39 = vld [vmem:[#allocation2 + $0xe8] sm:$0xff] }
 0x13c   : > { %v869_v40 = vadd.f32 %v807_v35, %v3985_v53 }
 0x13d   : > { %v4205_v5 = vadd.f32 %v1707_v42, %v1471_v37  ;;  %3365 = vmatmul.msk.f32.gmra.mxu2 %vm225_vm1, %v4201_v60  ;;  %v1722_v37 = vpop.f32.mrf.mxu0 }
 0x13e   : > { %3336 = vmatmul.msk.f32.gmra.mxu1 %vm225_vm1, %v4149_v41 }
 0x13f   : > { %4748 = vst [vmem:[#allocation43_spill] sm:$0xff] %v4205_v5  ;;  %3395 = vmatmul.msk.f32.gmra.mxu3 %vm225_vm1, %v4203_v50 }
 0x140   : > { %v1106_v16 = vpop.f32.mrf.mxu2  ;;  %3521 = vmatmul.msk.f32.gmra.mxu0 %vm225_vm1, %v3879_v63 }
 0x141   : > { %v1170_v30 = vadd.f32 %v1106_v16, %v868_v48 }
 0x142   : > { %v1408_v44 = vpop.f32.mrf.mxu3 }
 0x143   : > { %v1472_v42 = vadd.f32 %v1408_v44, %v1170_v30  ;;  %v810_v36 = vpop.f32.mrf.mxu1 }
 0x145   : > { %v4220_v5 = vadd.f32 %v1710_v46, %v1472_v42  ;;  %3366 = vmatmul.msk.f32.gmra.mxu2 %vm225_vm1, %v4216_v10  ;;  %v1725_v44 = vpop.f32.mrf.mxu0 }
 0x146   : > { %3429 = vmatmul.msk.f32.vlgmr.msra.gmra.mxu1 %vm225_vm1, %v3832_v55  ;;  %v870_v55 = vadd.f32 %v810_v36, %v4005_v38 }
 0x147   : > { %3396 = vmatmul.msk.f32.gmra.mxu3 %vm225_vm1, %v4218_v39 }
 0x148   : > { %v1109_v18 = vpop.f32.mrf.mxu2  ;;  %3522 = vmatmul.msk.f32.gmra.mxu0 %vm225_vm1, %v3893_v2 }
 0x149   : > { %v1171_v48 = vadd.f32 %v1109_v18, %v869_v40 }
 0x14a   : > { %v1411_v16 = vpop.f32.mrf.mxu3 }
 0x14b   : > { %v1473_v30 = vadd.f32 %v1411_v16, %v1171_v48  ;;  %v813_v46 = vpop.f32.mrf.mxu1 }
 0x14d   : > { %v4231_v42 = vadd.f32 %v1713_v21, %v1473_v30  ;;  %3459 = vmatmul.msk.f32.vlgmr.msra.gmra.mxu2 %vm225_vm1, %v3721_v25  ;;  %v1728_v48 = vpop.f32.mrf.mxu0  ;;  %v871_v25 = vadd.f32 %v813_v46, %v4023_v62  ;;  %v2153_v46 = vld [vmem:[#allocation2 + $0x38] sm:$0xff] }
 0x14e   : > { %3430 = vmatmul.msk.f32.gmra.mxu1 %vm225_vm1, %v3843_v57 }
 0x14f   : > { %3489 = vmatmul.msk.f32.vlgmr.msra.gmra.mxu3 %vm225_vm1, %v3809_v49 }
 0x150   : > { %v1112_v53 = vpop.f32.mrf.mxu2  ;;  %3523 = vmatmul.msk.f32.gmra.mxu0 %vm225_vm1, %v3909_v6 }
 0x151   : > { %v1172_v35 = vadd.f32 %v1112_v53, %v870_v55 }
 0x152   : > { %v1414_v40 = vpop.f32.mrf.mxu3 }
 0x153   : > { %v1474_v18 = vadd.f32 %v1414_v40, %v1172_v35  ;;  %v816_v21 = vpop.f32.mrf.mxu1 }
 0x155   : > { %v4242_v16 = vadd.f32 %v1716_v24, %v1474_v18  ;;  %3460 = vmatmul.msk.f32.gmra.mxu2 %vm225_vm1, %v3737_v29  ;;  %v1731_v30 = vpop.f32.mrf.mxu0  ;;  %v872_v29 = vadd.f32 %v816_v21, %v3939_v13 }
 0x156   : > { %3431 = vmatmul.msk.f32.gmra.mxu1 %vm225_vm1, %v3855_v59 }
 0x157   : > { %3490 = vmatmul.msk.f32.gmra.mxu3 %vm225_vm1, %v3817_v52 }
 0x158   : > { %v1115_v38 = vpop.f32.mrf.mxu2  ;;  %3524 = vmatmul.msk.f32.gmra.mxu0 %vm225_vm1, %v3923_v9 }
 0x159   : > { %v1173_v49 = vadd.f32 %v1115_v38, %v871_v25 }
 0x15a   : > { %v1417_v57 = vpop.f32.mrf.mxu3 }
 0x15b   : > { %v1475_v36 = vadd.f32 %v1417_v57, %v1173_v49  ;;  %v819_v24 = vpop.f32.mrf.mxu1 }
 0x15d   : > { %v4253_v55 = vadd.f32 %v1719_v28, %v1475_v36  ;;  %3461 = vmatmul.msk.f32.gmra.mxu2 %vm225_vm1, %v3756_v34  ;;  %v1734_v35 = vpop.f32.mrf.mxu0  ;;  %v873_v34 = vadd.f32 %v819_v24, %v3959_v33  ;;  %v4750_v33 = vld [vmem:[#allocation18_spill] sm:$0xff] }
 0x15e   : > { %3432 = vmatmul.msk.f32.gmra.mxu1 %vm225_vm1, %v3867_v61 }
 0x15f   : > { %3491 = vmatmul.msk.f32.gmra.mxu3 %vm225_vm1, %v3825_v54 }
 0x160   : > { %v1118_v52 = vpop.f32.mrf.mxu2  ;;  %3525 = vmatmul.msk.f32.gmra.mxu0 %vm225_vm1, %v3943_v15 }
 0x161   : > { %v1174_v59 = vadd.f32 %v1118_v52, %v872_v29  ;;  %v4753_v52 = vld [vmem:[#allocation9_spill] sm:$0xff] }
 0x162   : > { %v1420_v62 = vpop.f32.mrf.mxu3 }
 0x163   : > { %v1476_v28 = vadd.f32 %v1420_v62, %v1174_v59  ;;  %v822_v53 = vpop.f32.mrf.mxu1  ;;  %v4754_v59 = vld [vmem:[#allocation21_spill] sm:$0xff] }
 0x165   : > { %v4264_v40 = vadd.f32 %v1722_v37, %v1476_v28  ;;  %3462 = vmatmul.msk.f32.gmra.mxu2 %vm225_vm1, %v2153_v46  ;;  %v1737_v37 = vpop.f32.mrf.mxu0 }
 0x166   : > { %3433 = vmatmul.msk.f32.gmra.mxu1 %vm225_vm1, %v3879_v63  ;;  %v874_v63 = vadd.f32 %v822_v53, %v3979_v47 }
 0x167   : > { %3492 = vmatmul.msk.f32.gmra.mxu3 %vm225_vm1, %v3836_v56  ;;  %v4749_v56 = vld [vmem:[#allocation8_spill] sm:$0xff] }
 0x168   : > { %v1121_v54 = vpop.f32.mrf.mxu2  ;;  %3526 = vmatmul.msk.f32.gmra.mxu0 %vm225_vm1, %v4750_v33 }
 0x169   : > { %v1175_v61 = vadd.f32 %v1121_v54, %v873_v34 }
 0x16a   : > { %v1423_v13 = vpop.f32.mrf.mxu3 }
 0x16b   : > { %v1477_v18 = vadd.f32 %v1423_v13, %v1175_v61  ;;  %v825_v21 = vpop.f32.mrf.mxu1  ;;  %v4755_v61 = vld [vmem:[#allocation5_spill] sm:$0xff] }
 0x16d   : > { %v4274_v25 = vadd.f32 %v1725_v44, %v1477_v18  ;;  %3463 = vmatmul.msk.f32.gmra.mxu2 %vm225_vm1, %v3701_v19  ;;  %v1740_v24 = vpop.f32.mrf.mxu0  ;;  %v4751_v19 = vld [vmem:[#allocation4_spill] sm:$0xff]  ;;  %v4757_v18 = vld [vmem:[#allocation10_spill] sm:$0xff] }
 0x16e   : > { %3434 = vmatmul.msk.f32.gmra.mxu1 %vm225_vm1, %v3893_v2  ;;  %v4752_v2 = vld [vmem:[#allocation22_spill] sm:$0xff] }
 0x16f   : > { %3493 = vmatmul.msk.f32.gmra.mxu3 %vm225_vm1, %v4749_v56  ;;  %v875_v47 = vadd.f32 %v825_v21, %v4752_v2  ;;  %v4758_v21 = vld [vmem:[#allocation24_spill] sm:$0xff]  ;;  %v4761_v2 = vld [vmem:[#allocation11_spill] sm:$0xff] }
 0x170   : > { %v1124_v38 = vpop.f32.mrf.mxu2  ;;  %3527 = vmatmul.msk.f32.gmra.mxu0 %vm225_vm1, %v4754_v59 }
 0x171   : > { %v1176_v49 = vadd.f32 %v1124_v38, %v874_v63 }
 0x172   : > { %v1426_v57 = vpop.f32.mrf.mxu3 }
 0x173   : > { %v1478_v36 = vadd.f32 %v1426_v57, %v1176_v49  ;;  %v828_v44 = vpop.f32.mrf.mxu1 }
 0x175   : > { %v4285_v29 = vadd.f32 %v1728_v48, %v1478_v36  ;;  %3464 = vmatmul.msk.f32.gmra.mxu2 %vm225_vm1, %v4751_v19  ;;  %v1743_v34 = vpop.f32.mrf.mxu0  ;;  %v4759_v19 = vld [vmem:[#allocation6_spill] sm:$0xff] }
 0x176   : > { %3435 = vmatmul.msk.f32.gmra.mxu1 %vm225_vm1, %v3909_v6  ;;  %v4756_v6 = vld [vmem:[#allocation25_spill] sm:$0xff] }
 0x177   : > { %3494 = vmatmul.msk.f32.gmra.mxu3 %vm225_vm1, %v4753_v52  ;;  %v876_v13 = vadd.f32 %v828_v44, %v4756_v6  ;;  %v4763_v6 = vld [vmem:[#allocation7_spill] sm:$0xff] }
 0x178   : > { %v1127_v62 = vpop.f32.mrf.mxu2  ;;  %3528 = vmatmul.msk.f32.gmra.mxu0 %vm225_vm1, %v4758_v21 }
 0x179   : > { %v1177_v46 = vadd.f32 %v1127_v62, %v875_v47  ;;  %v4762_v47 = vld [vmem:[#allocation27_spill] sm:$0xff] }
 0x17a   : > { %v1429_v28 = vpop.f32.mrf.mxu3 }
 0x17b   : > { %v1479_v53 = vadd.f32 %v1429_v28, %v1177_v46  ;;  %v831_v48 = vpop.f32.mrf.mxu1 }
 0x17d   : > { %v4296_v54 = vadd.f32 %v1731_v30, %v1479_v53  ;;  %3465 = vmatmul.msk.f32.gmra.mxu2 %vm225_vm1, %v4755_v61  ;;  %v1746_v57 = vpop.f32.mrf.mxu0 }
 0x17e   : > { %3436 = vmatmul.msk.f32.gmra.mxu1 %vm225_vm1, %v3923_v9  ;;  %v4760_v9 = vld [vmem:[#allocation28_spill] sm:$0xff] }
 0x17f   : > { %3495 = vmatmul.msk.f32.gmra.mxu3 %vm225_vm1, %v4757_v18  ;;  %v877_v44 = vadd.f32 %v831_v48, %v4760_v9  ;;  %v4766_v18 = vld [vmem:[#allocation30_spill] sm:$0xff] }
 0x180   : > { %v1130_v63 = vpop.f32.mrf.mxu2  ;;  %3529 = vmatmul.msk.f32.gmra.mxu0 %vm225_vm1, %v4762_v47 }
 0x181   : > { %v1178_v56 = vadd.f32 %v1130_v63, %v876_v13  ;;  %v4765_v13 = vld [vmem:[#allocation12_spill] sm:$0xff] }
 0x182   : > { %v1432_v38 = vpop.f32.mrf.mxu3 }
 0x183   : > { %v1480_v49 = vadd.f32 %v1432_v38, %v1178_v56  ;;  %v834_v30 = vpop.f32.mrf.mxu1 }
 0x185   : > { %v4307_v36 = vadd.f32 %v1734_v35, %v1480_v49  ;;  %3466 = vmatmul.msk.f32.gmra.mxu2 %vm225_vm1, %v4759_v19  ;;  %v1749_v53 = vpop.f32.mrf.mxu0  ;;  %v2159_v49 = vld [vmem:[#allocation2 + $0x68] sm:$0xff] }
 0x186   : > { %3437 = vmatmul.msk.f32.gmra.mxu1 %vm225_vm1, %v3943_v15  ;;  %v4764_v15 = vld [vmem:[#allocation31_spill] sm:$0xff] }
 0x187   : > { %3496 = vmatmul.msk.f32.gmra.mxu3 %vm225_vm1, %v4761_v2  ;;  %v878_v48 = vadd.f32 %v834_v30, %v4764_v15  ;;  %v4768_v2 = vld [vmem:[#allocation13_spill] sm:$0xff] }
 0x188   : > { %v1133_v52 = vpop.f32.mrf.mxu2  ;;  %3530 = vmatmul.msk.f32.gmra.mxu0 %vm225_vm1, %v4766_v18 }
 0x189   : > { %v1179_v62 = vadd.f32 %v1133_v52, %v877_v44  ;;  %v4769_v52 = vld [vmem:[#allocation33_spill] sm:$0xff] }
 0x18a   : > { %v1435_v46 = vpop.f32.mrf.mxu3 }
 0x18b   : > { %v1481_v28 = vadd.f32 %v1435_v46, %v1179_v62  ;;  %v837_v35 = vpop.f32.mrf.mxu1 }
 0x18d   : > { %v4318_v61 = vadd.f32 %v1737_v37, %v1481_v28  ;;  %3467 = vmatmul.msk.f32.gmra.mxu2 %vm225_vm1, %v4763_v6  ;;  %v1752_v9 = vpop.f32.mrf.mxu0  ;;  %v2160_v6 = vld [vmem:[#allocation2 + $0x70] sm:$0xff] }
 0x18e   : > { %3438 = vmatmul.msk.f32.gmra.mxu1 %vm225_vm1, %v4750_v33  ;;  %v4767_v33 = vld [vmem:[#allocation15_spill] sm:$0xff] }
 0x18f   : > { %3497 = vmatmul.msk.f32.gmra.mxu3 %vm225_vm1, %v4765_v13  ;;  %v879_v30 = vadd.f32 %v837_v35, %v4767_v33 }
 0x190   : > { %v1136_v63 = vpop.f32.mrf.mxu2  ;;  %3531 = vmatmul.msk.f32.gmra.mxu0 %vm225_vm1, %v4769_v52 }
 0x191   : > { %v1180_v56 = vadd.f32 %v1136_v63, %v878_v48  ;;  %v4771_v63 = vld [vmem:[#allocation14_spill] sm:$0xff] }
 0x192   : > { %v1438_v38 = vpop.f32.mrf.mxu3 }
 0x193   : > { %v1482_v37 = vadd.f32 %v1438_v38, %v1180_v56  ;;  %v840_v19 = vpop.f32.mrf.mxu1 }
 0x195   : > { %v4329_v44 = vadd.f32 %v1740_v24, %v1482_v37  ;;  %3468 = vmatmul.msk.f32.gmra.mxu2 %vm225_vm1, %v2159_v49  ;;  %v1755_v48 = vpop.f32.mrf.mxu0  ;;  %v2161_v37 = vld [vmem:[#allocation2 + $0x78] sm:$0xff] }
 0x196   : > { %3439 = vmatmul.msk.f32.gmra.mxu1 %vm225_vm1, %v4754_v59  ;;  %v4770_v59 = vld [vmem:[#allocation17_spill] sm:$0xff] }
 0x197   : > { %3498 = vmatmul.msk.f32.gmra.mxu3 %vm225_vm1, %v4768_v2  ;;  %v880_v35 = vadd.f32 %v840_v19, %v4770_v59 }
 0x198   : > { %v1139_v62 = vpop.f32.mrf.mxu2  ;;  %3532 = vmatmul.msk.f32.gmra.mxu0 %vm225_vm1, %v4068_v43 }
 0x199   : > { %v1181_v46 = vadd.f32 %v1139_v62, %v879_v30  ;;  %v4773_v62 = vld [vmem:[#allocation16_spill] sm:$0xff] }
 0x19a   : > { %v1441_v28 = vpop.f32.mrf.mxu3 }
 0x19b   : > { %v1483_v15 = vadd.f32 %v1441_v28, %v1181_v46  ;;  %v843_v24 = vpop.f32.mrf.mxu1 }
 0x19d   : > { %v4339_v13 = vadd.f32 %v1743_v34, %v1483_v15  ;;  %3469 = vmatmul.msk.f32.gmra.mxu2 %vm225_vm1, %v2160_v6  ;;  %v1758_v30 = vpop.f32.mrf.mxu0  ;;  %v2162_v15 = vld [vmem:[#allocation2 + $0x80] sm:$0xff] }
 0x19e   : > { %3440 = vmatmul.msk.f32.gmra.mxu1 %vm225_vm1, %v4758_v21  ;;  %v4772_v21 = vld [vmem:[#allocation20_spill] sm:$0xff] }
 0x19f   : > { %3499 = vmatmul.msk.f32.gmra.mxu3 %vm225_vm1, %v4771_v63  ;;  %v881_v19 = vadd.f32 %v843_v24, %v4772_v21 }
 0x1a0   : > { %v1142_v56 = vpop.f32.mrf.mxu2  ;;  %3533 = vmatmul.msk.f32.gmra.mxu0 %vm225_vm1, %v4083_v1 }
 0x1a1   : > { %v1182_v38 = vadd.f32 %v1142_v56, %v880_v35  ;;  %v4775_v56 = vld [vmem:[#allocation19_spill] sm:$0xff] }
 0x1a2   : > { %v1444_v49 = vpop.f32.mrf.mxu3 }
 0x1a3   : > { %v1484_v33 = vadd.f32 %v1444_v49, %v1182_v38  ;;  %v846_v34 = vpop.f32.mrf.mxu1 }
 0x1a5   : > { %v4349_v2 = vadd.f32 %v1746_v57, %v1484_v33  ;;  %3470 = vmatmul.msk.f32.gmra.mxu2 %vm225_vm1, %v2161_v37  ;;  %v1761_v35 = vpop.f32.mrf.mxu0  ;;  %v2163_v33 = vld [vmem:[#allocation2 + $0x88] sm:$0xff] }
 0x1a6   : > { %3441 = vmatmul.msk.f32.gmra.mxu1 %vm225_vm1, %v4762_v47  ;;  %v4774_v47 = vld [vmem:[#allocation23_spill] sm:$0xff] }
 0x1a7   : > { %3500 = vmatmul.msk.f32.gmra.mxu3 %vm225_vm1, %v4773_v62  ;;  %v882_v24 = vadd.f32 %v846_v34, %v4774_v47 }
 0x1a8   : > { %v1145_v46 = vpop.f32.mrf.mxu2  ;;  %3534 = vmatmul.msk.f32.gmra.mxu0 %vm225_vm1, %v4098_v45 }
 0x1a9   : > { %v1183_v28 = vadd.f32 %v1145_v46, %v881_v19 }
 0x1aa   : > { %v1447_v6 = vpop.f32.mrf.mxu3 }
 0x1ab   : > { %v1485_v59 = vadd.f32 %v1447_v6, %v1183_v28  ;;  %v849_v57 = vpop.f32.mrf.mxu1 }
 0x1ad   : > { %v4359_v63 = vadd.f32 %v1749_v53, %v1485_v59  ;;  %3471 = vmatmul.msk.f32.gmra.mxu2 %vm225_vm1, %v2162_v15  ;;  %v2888_v19 = vpop.f32.mrf.mxu0  ;;  %v2164_v15 = vld [vmem:[#allocation2 + $0x90] sm:$0xff] }
 0x1ae   : > { %3442 = vmatmul.msk.f32.gmra.mxu1 %vm225_vm1, %v4766_v18  ;;  %v4776_v18 = vld [vmem:[#allocation26_spill] sm:$0xff] }
 0x1af   : > { %3501 = vmatmul.msk.f32.gmra.mxu3 %vm225_vm1, %v4775_v56  ;;  %v883_v34 = vadd.f32 %v849_v57, %v4776_v18 }
 0x1b0   : > { %v1148_v38 = vpop.f32.mrf.mxu2  ;;  %3535 = vmatmul.msk.f32.gmra.mxu0 %vm225_vm1, %v4113_v22 }
 0x1b1   : > { %v1184_v49 = vadd.f32 %v1148_v38, %v882_v24 }
 0x1b2   : > { %v1450_v37 = vpop.f32.mrf.mxu3 }
 0x1b3   : > { %v1486_v21 = vadd.f32 %v1450_v37, %v1184_v49  ;;  %v852_v53 = vpop.f32.mrf.mxu1  ;;  %v2165_v49 = vld [vmem:[#allocation2 + $0x98] sm:$0xff] }
 0x1b5   : > { %v4369_v62 = vadd.f32 %v1752_v9, %v1486_v21  ;;  %3472 = vmatmul.msk.f32.gmra.mxu2 %vm225_vm1, %v2163_v33  ;;  %v2891_v47 = vpop.f32.mrf.mxu0 }
 0x1b6   : > { %3443 = vmatmul.msk.f32.gmra.mxu1 %vm225_vm1, %v4769_v52  ;;  %v4777_v52 = vld [vmem:[#allocation29_spill] sm:$0xff] }
 0x1b7   : > { %3502 = vmatmul.msk.f32.gmra.mxu3 %vm225_vm1, %v3991_v14  ;;  %v884_v57 = vadd.f32 %v852_v53, %v4777_v52 }
 0x1b8   : > { %v1151_v46 = vpop.f32.mrf.mxu2  ;;  %3536 = vmatmul.msk.f32.gmra.mxu0 %vm225_vm1, %v4128_v20 }
 0x1b9   : > { %v1185_v28 = vadd.f32 %v1151_v46, %v883_v34  ;;  %v2166_v46 = vld [vmem:[#allocation2 + $0xa0] sm:$0xff] }
 0x1ba   : > { %v1453_v6 = vpop.f32.mrf.mxu3 }
 0x1bb   : > { %v1487_v59 = vadd.f32 %v1453_v6, %v1185_v28  ;;  %v855_v9 = vpop.f32.mrf.mxu1 }
 0x1bd   : > { %v4379_v24 = vadd.f32 %v1755_v48, %v1487_v59  ;;  %3473 = vmatmul.msk.f32.gmra.mxu2 %vm225_vm1, %v2164_v15  ;;  %v4389_v33 = vpop.f32.mrf.mxu0 }
 0x1be   : > { %3444 = vmatmul.msk.f32.gmra.mxu1 %vm225_vm1, %v4068_v43  ;;  %v4778_v43 = vld [vmem:[#allocation32_spill] sm:$0xff] }
 0x1bf   : > { %3503 = vmatmul.msk.f32.gmra.mxu3 %vm225_vm1, %v4009_v31  ;;  %v885_v31 = vadd.f32 %v855_v9, %v4778_v43 }
 0x1c0   : > { %v1154_v14 = vpop.f32.mrf.mxu2  ;;  %3537 = vmatmul.msk.f32.gmra.mxu0 %vm225_vm1, %v4143_v26 }
 0x1c1   : > { %v1186_v56 = vadd.f32 %v1154_v14, %v884_v57  ;;  %v2167_v57 = vld [vmem:[#allocation2 + $0xa8] sm:$0xff] }
 0x1c2   : > { %v1456_v38 = vpop.f32.mrf.mxu3 }
 0x1c3   : > { %v1488_v37 = vadd.f32 %v1456_v38, %v1186_v56  ;;  %v1982_v48 = vpop.f32.mrf.mxu1  ;;  %v4416_v56 = vld [vmem:[%s4678_s2] ss:$0 sm:$0xff] }
 0x1c5   : > { %v4391_v21 = vadd.f32 %v1758_v30, %v1488_v37  ;;  %3474 = vmatmul.msk.f32.gmra.mxu2 %vm225_vm1, %v2165_v49  ;;  %v4401_v6 = vpop.f32.mrf.mxu0 }
 0x1c6   : > { %3445 = vmatmul.msk.f32.gmra.mxu1 %vm225_vm1, %v4083_v1  ;;  %v4779_v1 = vld [vmem:[#allocation34_spill] sm:$0xff] }
 0x1c7   : > { %3504 = vmatmul.msk.f32.gmra.mxu3 %vm225_vm1, %v4027_v27  ;;  %v2066_v27 = vadd.f32 %v1982_v48, %v4779_v1  ;;  %v4428_v48 = vld [vmem:[%s4679_s3] ss:$0 sm:$0xff] }
 0x1c8   : > { %v1157_v53 = vpop.f32.mrf.mxu2  ;;  %3538 = vmatmul.msk.f32.gmra.mxu0 %vm225_vm1, %v4158_v23 }
 0x1c9   : > { %v1187_v18 = vadd.f32 %v1157_v53, %v885_v31 }
 0x1ca   : > { %v1459_v34 = vpop.f32.mrf.mxu3 }
 0x1cb   : > { %v1489_v28 = vadd.f32 %v1459_v34, %v1187_v18  ;;  %v1985_v30 = vpop.f32.mrf.mxu1  ;;  %v2168_v18 = vld [vmem:[#allocation2 + $0xb0] sm:$0xff] }
 0x1cd   : > { %v4403_v15 = vadd.f32 %v1761_v35, %v1489_v28  ;;  %3475 = vmatmul.msk.f32.gmra.mxu2 %vm225_vm1, %v2166_v46 }
 0x1ce   : > { %3446 = vmatmul.msk.f32.gmra.mxu1 %vm225_vm1, %v4098_v45  ;;  %v4418_v45 = vpop.f32.mrf.mxu0 }
 0x1cf   : > { %3505 = vmatmul.msk.f32.gmra.mxu3 %vm225_vm1, %v4043_v8  ;;  %v4780_v8 = vld [vmem:[#allocation35_spill] sm:$0xff] }
 0x1d0   : > { %v2284_v59 = vpop.f32.mrf.mxu2  ;;  %v2067_v49 = vadd.f32 %v1985_v30, %v4780_v8  ;;  %3539 = vmatmul.msk.f32.gmra.mxu0 %vm225_vm1, %v4173_v4 }
 0x1d1   : > { %v2368_v9 = vadd.f32 %v2284_v59, %v2066_v27  ;;  %v4781_v27 = vld [vmem:[#allocation36_spill] sm:$0xff] }
 0x1d2   : > { %v2586_v52 = vpop.f32.mrf.mxu3 }
 0x1d3   : > { %v2670_v35 = vadd.f32 %v2586_v52, %v2368_v9  ;;  %v1988_v14 = vpop.f32.mrf.mxu1 }
 0x1d4   : > { %v2068_v59 = vadd.f32 %v1988_v14, %v4781_v27 }
 0x1d5   : > { %v2972_v38 = vadd.f32 %v2888_v19, %v2670_v35  ;;  %3476 = vmatmul.msk.f32.gmra.mxu2 %vm225_vm1, %v2167_v57 }
 0x1d6   : > { %3447 = vmatmul.msk.f32.gmra.mxu1 %vm225_vm1, %v4113_v22  ;;  %v4438_v22 = vld [vmem:[%s4680_s4] ss:$0 sm:$0xff] }
 0x1d7   : > { %v3060_v37 = vadd.f32 %v4416_v56, %v2972_v38  ;;  %3506 = vmatmul.msk.f32.gmra.mxu3 %vm225_vm1, %v4059_v12  ;;  %v4446_v12 = vpop.f32.mrf.mxu0  ;;  %v2169_v38 = vld [vmem:[#allocation2 + $0xb8] sm:$0xff] }
 0x1d8   : > { %v2287_v19 = vpop.f32.mrf.mxu2  ;;  %3540 = vmatmul.msk.f32.gmra.mxu0 %vm225_vm1, %v4188_v51 }
 0x1d9   : > { %v3088_v43 = vmax.f32 %v3060_v37, 0.0  ;;  %v2369_v31 = vadd.f32 %v2287_v19, %v2067_v49 }
 0x1da   : > { %v2589_v53 = vpop.f32.mrf.mxu3 }
 0x1db   : > { %v3120_v34 = vmul.f32 %v4428_v48, %v3088_v43  ;;  %v2671_v46 = vadd.f32 %v2589_v53, %v2369_v31  ;;  %v1991_v28 = vpop.f32.mrf.mxu1 }
 0x1dd   : > { %v3152_v30 = vadd.f32 %v4438_v22, %v3120_v34  ;;  %v2973_v1 = vadd.f32 %v2891_v47, %v2671_v46  ;;  %3477 = vmatmul.msk.f32.gmra.mxu2 %vm225_vm1, %v2168_v18  ;;  %v2170_v46 = vld [vmem:[#allocation2 + $0xc0] sm:$0xff] }
 0x1de   : > { %3448 = vmatmul.msk.f32.gmra.mxu1 %vm225_vm1, %v4128_v20 }
 0x1df   : > { %3180 = vst [vmem:[%s4444_s28] sm:$0xff] %v3152_v30  ;;  %v3061_v9 = vadd.f32 %v4416_v56, %v2973_v1  ;;  %3507 = vmatmul.msk.f32.gmra.mxu3 %vm225_vm1, %v4074_v0  ;;  %v4460_v14 = vpop.f32.mrf.mxu0  ;;  %v4782_v0 = vld [vmem:[#allocation37_spill] sm:$0xff] }
 0x1e0   : > { %v2290_v52 = vpop.f32.mrf.mxu2  ;;  %v2069_v43 = vadd.f32 %v1991_v28, %v4782_v0  ;;  %3541 = vmatmul.msk.f32.gmra.mxu0 %vm225_vm1, %v4201_v60  ;;  %v4784_v0 = vld [vmem:[#allocation39_spill] sm:$0xff] }
 0x1e1   : > { %v3089_v57 = vmax.f32 %v3061_v9, 0.0  ;;  %v2370_v47 = vadd.f32 %v2290_v52, %v2068_v59 }
 0x1e2   : > { %v2592_v35 = vpop.f32.mrf.mxu3 }
 0x1e3   : > { %v3121_v8 = vmul.f32 %v4428_v48, %v3089_v57  ;;  %v2672_v20 = vadd.f32 %v2592_v35, %v2370_v47  ;;  %v1994_v49 = vpop.f32.mrf.mxu1 }
 0x1e5   : > { %v3153_v37 = vadd.f32 %v4438_v22, %v3121_v8  ;;  %v2974_v19 = vadd.f32 %v4389_v33, %v2672_v20  ;;  %3478 = vmatmul.msk.f32.gmra.mxu2 %vm225_vm1, %v2169_v38  ;;  %v2171_v38 = vld [vmem:[#allocation2 + $0xc8] sm:$0xff] }
 0x1e6   : > { %3449 = vmatmul.msk.f32.gmra.mxu1 %vm225_vm1, %v4143_v26 }
 0x1e7   : > { %3181 = vst [vmem:[%s4444_s28 + $0x8] sm:$0x3f] %v3153_v37  ;;  %v3062_v31 = vadd.f32 %v4416_v56, %v2974_v19  ;;  %3508 = vmatmul.msk.f32.gmra.mxu3 %vm225_vm1, %v4089_v3  ;;  %v4475_v28 = vpop.f32.mrf.mxu0  ;;  %v4783_v3 = vld [vmem:[#allocation38_spill] sm:$0xff] }
 0x1e8   : > { %v2293_v53 = vpop.f32.mrf.mxu2  ;;  %v2070_v9 = vadd.f32 %v1994_v49, %v4783_v3  ;;  %3542 = vmatmul.msk.f32.gmra.mxu0 %vm225_vm1, %v4216_v10 }
 0x1e9   : > { %v3090_v18 = vmax.f32 %v3062_v31, 0.0  ;;  %v2371_v33 = vadd.f32 %v2293_v53, %v2069_v43 }
 0x1ea   : > { %v2595_v34 = vpop.f32.mrf.mxu3 }
 0x1eb   : > { %v3122_v30 = vmul.f32 %v4428_v48, %v3090_v18  ;;  %v2673_v26 = vadd.f32 %v2595_v34, %v2371_v33  ;;  %v1997_v1 = vpop.f32.mrf.mxu1  ;;  %v2172_v34 = vld [vmem:[#allocation2 + $0xd0] sm:$0xff] }
 0x1ec   : > { %v2071_v43 = vadd.f32 %v1997_v1, %v4784_v0 }
 0x1ed   : > { %v3154_v27 = vadd.f32 %v4438_v22, %v3122_v30  ;;  %v2975_v59 = vadd.f32 %v4401_v6, %v2673_v26  ;;  %3479 = vmatmul.msk.f32.gmra.mxu2 %vm225_vm1, %v2170_v46 }
 0x1ee   : > { %3450 = vmatmul.msk.f32.gmra.mxu1 %vm225_vm1, %v4158_v23 }
 0x1ef   : > { %3182 = vst [vmem:[%s4444_s28 + $0x10] sm:$0xff] %v3154_v27  ;;  %v3063_v52 = vadd.f32 %v4416_v56, %v2975_v59  ;;  %3509 = vmatmul.msk.f32.gmra.mxu3 %vm225_vm1, %v4104_v7  ;;  %v4490_v49 = vpop.f32.mrf.mxu0  ;;  %v4497_v7 = vld [vmem:[#allocation2 + $0xe2] sm:$0xff] }
 0x1f0   : > { %v2296_v57 = vpop.f32.mrf.mxu2  ;;  %3543 = vmatmul.msk.f32.gmra.mxu0 %vm225_vm1, %v4497_v7  ;;  %v4785_v59 = vld [vmem:[#allocation40_spill] sm:$0xff] }
 0x1f1   : > { %v3091_v47 = vmax.f32 %v3063_v52, 0.0  ;;  %v2372_v6 = vadd.f32 %v2296_v57, %v2070_v9 }
 0x1f2   : > { %v2598_v35 = vpop.f32.mrf.mxu3 }
 0x1f3   : > { %v3123_v8 = vmul.f32 %v4428_v48, %v3091_v47  ;;  %v2674_v23 = vadd.f32 %v2598_v35, %v2372_v6  ;;  %v2000_v20 = vpop.f32.mrf.mxu1  ;;  %v2173_v6 = vld [vmem:[#allocation2 + $0xd8] sm:$0xff] }
 0x1f4   : > { %v2072_v3 = vadd.f32 %v2000_v20, %v4785_v59 }
 0x1f5   : > { %v3155_v37 = vadd.f32 %v4438_v22, %v3123_v8  ;;  %v2976_v19 = vadd.f32 %v4418_v45, %v2674_v23  ;;  %3480 = vmatmul.msk.f32.gmra.mxu2 %vm225_vm1, %v2171_v38 }
 0x1f6   : > { %3451 = vmatmul.msk.f32.gmra.mxu1 %vm225_vm1, %v4173_v4 }
 0x1f7   : > { %3183 = vst [vmem:[%s4444_s28 + $0x18] sm:$0x3f] %v3155_v37  ;;  %v3064_v31 = vadd.f32 %v4416_v56, %v2976_v19  ;;  %3510 = vmatmul.msk.f32.gmra.mxu3 %vm225_vm1, %v4119_v11  ;;  %v4507_v26 = vpop.f32.mrf.mxu0  ;;  %v4514_v11 = vld [vmem:[#allocation2 + $0xea] sm:$0xff] }
 0x1f8   : > { %v2299_v45 = vpop.f32.mrf.mxu2  ;;  %3544 = vmatmul.msk.f32.gmra.mxu0 %vm225_vm1, %v4514_v11 }
 0x1f9   : > { %v3092_v53 = vmax.f32 %v3064_v31, 0.0  ;;  %v2373_v18 = vadd.f32 %v2299_v45, %v2071_v43 }
 0x1fa   : > { %v2601_v33 = vpop.f32.mrf.mxu3 }
 0x1fb   : > { %v3124_v4 = vmul.f32 %v4428_v48, %v3092_v53  ;;  %v2675_v46 = vadd.f32 %v2601_v33, %v2373_v18  ;;  %v2003_v30 = vpop.f32.mrf.mxu1 }
 0x1fc   : > { %v2073_v37 = vadd.f32 %v2003_v30, %v4175_v58 }
 0x1fd   : > { %v3156_v1 = vadd.f32 %v4438_v22, %v3124_v4  ;;  %v2977_v27 = vadd.f32 %v4446_v12, %v2675_v46  ;;  %3481 = vmatmul.msk.f32.gmra.mxu2 %vm225_vm1, %v2172_v34  ;;  %v4786_v46 = vld [vmem:[#allocation41_spill] sm:$0xff] }
 0x1fe   : > { %3452 = vmatmul.msk.f32.gmra.mxu1 %vm225_vm1, %v4188_v51 }
 0x1ff   : > { %3184 = vst [vmem:[%s4444_s28 + $0x20] sm:$0xff] %v3156_v1  ;;  %v3065_v9 = vadd.f32 %v4416_v56, %v2977_v27  ;;  %3511 = vmatmul.msk.f32.gmra.mxu3 %vm225_vm1, %v4134_v17  ;;  %v4524_v8 = vpop.f32.mrf.mxu0  ;;  %v2780_v17 = vld [vmem:[#allocation2 + $0xf2] sm:$0xff] }
 0x200   : > { %v2302_v12 = vpop.f32.mrf.mxu2  ;;  %3545 = vmatmul.msk.f32.gmra.mxu0 %vm225_vm1, %v2780_v17  ;;  %v2478_v17 = vld [vmem:[#allocation2 + $0xf1] sm:$0xff] }
 0x201   : > { %v3093_v52 = vmax.f32 %v3065_v9, 0.0  ;;  %v2374_v57 = vadd.f32 %v2302_v12, %v2072_v3  ;;  %v4787_v12 = vld [vmem:[#allocation43_spill] sm:$0xff] }
 0x202   : > { %v2604_v47 = vpop.f32.mrf.mxu3 }
 0x203   : > { %v3125_v51 = vmul.f32 %v4428_v48, %v3093_v52  ;;  %v2676_v35 = vadd.f32 %v2604_v47, %v2374_v57  ;;  %v2006_v38 = vpop.f32.mrf.mxu1  ;;  %v4788_v47 = vld [vmem:[#allocation42_spill] sm:$0xff] }
 0x204   : > { %v2074_v34 = vadd.f32 %v2006_v38, %v4190_v32 }
 0x205   : > { %v3157_v23 = vadd.f32 %v4438_v22, %v3125_v51  ;;  %v2978_v20 = vadd.f32 %v4460_v14, %v2676_v35  ;;  %3482 = vmatmul.msk.f32.gmra.mxu2 %vm225_vm1, %v2173_v6 }
 0x206   : > { %3453 = vmatmul.msk.f32.gmra.mxu1 %vm225_vm1, %v4201_v60 }
 0x207   : > { %3185 = vst [vmem:[%s4444_s28 + $0x28] sm:$0x3f] %v3157_v23  ;;  %v3066_v19 = vadd.f32 %v4416_v56, %v2978_v20  ;;  %3512 = vmatmul.msk.f32.gmra.mxu3 %vm225_vm1, %v4149_v41  ;;  %v4538_v18 = vpop.f32.mrf.mxu0  ;;  %v2781_v41 = vld [vmem:[#allocation2 + $0xfa] sm:$0xff] }
 0x208   : > { %v2305_v0 = vpop.f32.mrf.mxu2  ;;  %3546 = vmatmul.msk.f32.gmra.mxu0 %vm225_vm1, %v2781_v41  ;;  %v2479_v41 = vld [vmem:[#allocation2 + $0xf9] sm:$0xff] }
 0x209   : > { %v3094_v43 = vmax.f32 %v3066_v19, 0.0  ;;  %v2375_v14 = vadd.f32 %v2305_v0, %v2073_v37 }
 0x20a   : > { %v2607_v31 = vpop.f32.mrf.mxu3 }
 0x20b   : > { %v3126_v45 = vmul.f32 %v4428_v48, %v3094_v43  ;;  %v2677_v53 = vadd.f32 %v2607_v31, %v2375_v14  ;;  %v2009_v60 = vpop.f32.mrf.mxu1 }
 0x20c   : > { %v2075_v52 = vadd.f32 %v2009_v60, %v4787_v12  ;;  %v2177_v60 = vld [vmem:[#allocation2 + $0xf8] sm:$0xff] }
 0x20d   : > { %v3158_v58 = vadd.f32 %v4438_v22, %v3126_v45  ;;  %v2979_v33 = vadd.f32 %v4475_v28, %v2677_v53  ;;  %3483 = vmatmul.msk.f32.gmra.mxu2 %vm225_vm1, %v4203_v50 }
 0x20e   : > { %3454 = vmatmul.msk.f32.gmra.mxu1 %vm225_vm1, %v4216_v10 }
 0x20f   : > { %3186 = vst [vmem:[%s4444_s28 + $0x30] sm:$0xff] %v3158_v58  ;;  %v3067_v4 = vadd.f32 %v4416_v56, %v2979_v33  ;;  %3513 = vmatmul.msk.f32.gmra.mxu3 %vm225_vm1, %v4786_v46  ;;  %v4553_v3 = vpop.f32.mrf.mxu0 }
 0x210   : > { %v2308_v30 = vpop.f32.mrf.mxu2 }
 0x211   : > { %v3095_v28 = vmax.f32 %v3067_v4, 0.0  ;;  %v2376_v1 = vadd.f32 %v2308_v30, %v2074_v34 }
 0x212   : > { %v2610_v27 = vpop.f32.mrf.mxu3 }
 0x213   : > { %v3127_v50 = vmul.f32 %v4428_v48, %v3095_v28  ;;  %v2678_v59 = vadd.f32 %v2610_v27, %v2376_v1  ;;  %v2012_v10 = vpop.f32.mrf.mxu1 }
 0x214   : > { %v2076_v0 = vadd.f32 %v2012_v10, %v4220_v5 }
 0x215   : > { %v3159_v32 = vadd.f32 %v4438_v22, %v3127_v50  ;;  %v2980_v9 = vadd.f32 %v4490_v49, %v2678_v59  ;;  %3484 = vmatmul.msk.f32.gmra.mxu2 %vm225_vm1, %v4218_v39  ;;  %v2176_v49 = vld [vmem:[#allocation2 + $0xf0] sm:$0xff] }
 0x216   : > { %3455 = vmatmul.msk.f32.gmra.mxu1 %vm225_vm1, %v4497_v7 }
 0x217   : > { %3187 = vst [vmem:[%s4444_s28 + $0x38] sm:$0x3f] %v3159_v32  ;;  %v3068_v57 = vadd.f32 %v4416_v56, %v2980_v9  ;;  %3514 = vmatmul.msk.f32.gmra.mxu3 %vm225_vm1, %v4788_v47  ;;  %v2927_v19 = vpop.f32.mrf.mxu0 }
 0x218   : > { %v2311_v6 = vpop.f32.mrf.mxu2 }
 0x219   : > { %v3096_v51 = vmax.f32 %v3068_v57, 0.0  ;;  %v2377_v35 = vadd.f32 %v2311_v6, %v2075_v52 }
 0x21a   : > { %v2613_v38 = vpop.f32.mrf.mxu3 }
 0x21b   : > { %v3128_v23 = vmul.f32 %v4428_v48, %v3096_v51  ;;  %v2679_v39 = vadd.f32 %v2613_v38, %v2377_v35  ;;  %v2015_v20 = vpop.f32.mrf.mxu1 }
 0x21c   : > { %v2077_v34 = vadd.f32 %v2015_v20, %v4231_v42 }
 0x21d   : > { %v3160_v7 = vadd.f32 %v4438_v22, %v3128_v23  ;;  %v2981_v37 = vadd.f32 %v4507_v26, %v2679_v39  ;;  %3485 = vmatmul.msk.f32.gmra.mxu2 %vm225_vm1, %v2176_v49 }
 0x21e   : > { %3456 = vmatmul.msk.f32.gmra.mxu1 %vm225_vm1, %v4514_v11 }
 0x21f   : > { %3188 = vst [vmem:[%s4444_s28 + $0x40] sm:$0xff] %v3160_v7  ;;  %v3069_v43 = vadd.f32 %v4416_v56, %v2981_v37  ;;  %3515 = vmatmul.msk.f32.gmra.mxu3 %vm225_vm1, %v2478_v17  ;;  %v2930_v30 = vpop.f32.mrf.mxu0 }
 0x220   : > { %v2314_v14 = vpop.f32.mrf.mxu2 }
 0x221   : > { %v3097_v31 = vmax.f32 %v3069_v43, 0.0  ;;  %v2378_v45 = vadd.f32 %v2314_v14, %v2076_v0 }
 0x222   : > { %v2616_v53 = vpop.f32.mrf.mxu3 }
 0x223   : > { %v3129_v26 = vmul.f32 %v4428_v48, %v3097_v31  ;;  %v2680_v58 = vadd.f32 %v2616_v53, %v2378_v45  ;;  %v2018_v33 = vpop.f32.mrf.mxu1 }
 0x224   : > { %v2078_v42 = vadd.f32 %v2018_v33, %v4242_v16 }
 0x225   : > { %v3161_v11 = vadd.f32 %v4438_v22, %v3129_v26  ;;  %v2982_v5 = vadd.f32 %v4524_v8, %v2680_v58  ;;  %3486 = vmatmul.msk.f32.gmra.mxu2 %vm225_vm1, %v2177_v60 }
 0x227   : > { %3189 = vst [vmem:[%s4444_s28 + $0x48] sm:$0x3f] %v3161_v11  ;;  %v3070_v4 = vadd.f32 %v4416_v56, %v2982_v5  ;;  %3516 = vmatmul.msk.f32.gmra.mxu3 %vm225_vm1, %v2479_v41  ;;  %v2933_v6 = vpop.f32.mrf.mxu0 }
 0x228   : > { %v2317_v46 = vpop.f32.mrf.mxu2 }
 0x229   : > { %v3098_v28 = vmax.f32 %v3070_v4, 0.0  ;;  %v2379_v1 = vadd.f32 %v2317_v46, %v2077_v34 }
 0x22a   : > { %v2619_v27 = vpop.f32.mrf.mxu3 }
 0x22b   : > { %v3130_v50 = vmul.f32 %v4428_v48, %v3098_v28  ;;  %v2681_v59 = vadd.f32 %v2619_v27, %v2379_v1  ;;  %v2021_v10 = vpop.f32.mrf.mxu1 }
 0x22d   : > { %v3162_v8 = vadd.f32 %v4438_v22, %v3130_v50  ;;  %v2983_v32 = vadd.f32 %v4538_v18, %v2681_v59  ;;  %v2079_v18 = vadd.f32 %v2021_v10, %v4253_v55 }
 0x22f   : > { %3190 = vst [vmem:[%s4444_s28 + $0x50] sm:$0xff] %v3162_v8  ;;  %v3071_v9 = vadd.f32 %v4416_v56, %v2983_v32  ;;  %v2936_v14 = vpop.f32.mrf.mxu0 }
 0x230   : > { %v2320_v12 = vpop.f32.mrf.mxu2 }
 0x231   : > { %v3099_v52 = vmax.f32 %v3071_v9, 0.0  ;;  %v2380_v57 = vadd.f32 %v2320_v12, %v2078_v42 }
 0x232   : > { %v2622_v47 = vpop.f32.mrf.mxu3 }
 0x233   : > { %v3131_v51 = vmul.f32 %v4428_v48, %v3099_v52  ;;  %v2682_v35 = vadd.f32 %v2622_v47, %v2380_v57  ;;  %v2024_v38 = vpop.f32.mrf.mxu1 }
 0x235   : > { %v3163_v49 = vadd.f32 %v4438_v22, %v3131_v51  ;;  %v2984_v23 = vadd.f32 %v4553_v3, %v2682_v35  ;;  %v2080_v3 = vadd.f32 %v2024_v38, %v4264_v40 }
 0x237   : > { %3191 = vst [vmem:[%s4444_s28 + $0x58] sm:$0x3f] %v3163_v49  ;;  %v3072_v16 = vadd.f32 %v4416_v56, %v2984_v23  ;;  %v2939_v4 = vpop.f32.mrf.mxu0 }
 0x238   : > { %v2323_v39 = vpop.f32.mrf.mxu2 }
 0x239   : > { %v3100_v20 = vmax.f32 %v3072_v16, 0.0  ;;  %v2381_v17 = vadd.f32 %v2323_v39, %v2079_v18 }
 0x23a   : > { %v2625_v7 = vpop.f32.mrf.mxu3 }
 0x23b   : > { %v3132_v37 = vmul.f32 %v4428_v48, %v3100_v20  ;;  %v2683_v0 = vadd.f32 %v2625_v7, %v2381_v17  ;;  %v2027_v43 = vpop.f32.mrf.mxu1 }
 0x23d   : > { %v3164_v31 = vadd.f32 %v4438_v22, %v3132_v37  ;;  %v2985_v45 = vadd.f32 %v2927_v19, %v2683_v0  ;;  %v2081_v19 = vadd.f32 %v2027_v43, %v4274_v25 }
 0x23f   : > { %3192 = vst [vmem:[%s4444_s28 + $0x60] sm:$0xff] %v3164_v31  ;;  %v3073_v55 = vadd.f32 %v4416_v56, %v2985_v45  ;;  %v2942_v9 = vpop.f32.mrf.mxu0 }
 0x240   : > { %v2326_v53 = vpop.f32.mrf.mxu2 }
 0x241   : > { %v3101_v60 = vmax.f32 %v3073_v55, 0.0  ;;  %v2382_v26 = vadd.f32 %v2326_v53, %v2080_v3 }
 0x242   : > { %v2628_v58 = vpop.f32.mrf.mxu3 }
 0x243   : > { %v3133_v33 = vmul.f32 %v4428_v48, %v3101_v60  ;;  %v2684_v41 = vadd.f32 %v2628_v58, %v2382_v26  ;;  %v2030_v11 = vpop.f32.mrf.mxu1 }
 0x245   : > { %v3165_v5 = vadd.f32 %v4438_v22, %v3133_v33  ;;  %v2986_v34 = vadd.f32 %v2930_v30, %v2684_v41  ;;  %v2082_v30 = vadd.f32 %v2030_v11, %v4285_v29 }
 0x247   : > { %3193 = vst [vmem:[%s4444_s28 + $0x68] sm:$0x3f] %v3165_v5  ;;  %v3074_v40 = vadd.f32 %v4416_v56, %v2986_v34  ;;  %v2945_v20 = vpop.f32.mrf.mxu0 }
 0x248   : > { %v2329_v46 = vpop.f32.mrf.mxu2 }
 0x249   : > { %v3102_v28 = vmax.f32 %v3074_v40, 0.0  ;;  %v2383_v1 = vadd.f32 %v2329_v46, %v2081_v19 }
 0x24a   : > { %v2631_v27 = vpop.f32.mrf.mxu3 }
 0x24b   : > { %v3134_v50 = vmul.f32 %v4428_v48, %v3102_v28  ;;  %v2685_v59 = vadd.f32 %v2631_v27, %v2383_v1  ;;  %v2033_v10 = vpop.f32.mrf.mxu1 }
 0x24d   : > { %v3166_v8 = vadd.f32 %v4438_v22, %v3134_v50  ;;  %v2987_v32 = vadd.f32 %v2933_v6, %v2685_v59  ;;  %v2083_v6 = vadd.f32 %v2033_v10, %v4296_v54 }
 0x24f   : > { %3194 = vst [vmem:[%s4444_s28 + $0x70] sm:$0xff] %v3166_v8  ;;  %v3075_v25 = vadd.f32 %v4416_v56, %v2987_v32  ;;  %v2948_v58 = vpop.f32.mrf.mxu0 }
 0x250   : > { %v2332_v42 = vpop.f32.mrf.mxu2 }
 0x251   : > { %v3103_v12 = vmax.f32 %v3075_v25, 0.0  ;;  %v2384_v52 = vadd.f32 %v2332_v42, %v2082_v30 }
 0x252   : > { %v2634_v57 = vpop.f32.mrf.mxu3 }
 0x253   : > { %v3135_v47 = vmul.f32 %v4428_v48, %v3103_v12  ;;  %v2686_v51 = vadd.f32 %v2634_v57, %v2384_v52  ;;  %v2036_v35 = vpop.f32.mrf.mxu1 }
 0x255   : > { %v3167_v38 = vadd.f32 %v4438_v22, %v3135_v47  ;;  %v2988_v49 = vadd.f32 %v2936_v14, %v2686_v51  ;;  %v2084_v14 = vadd.f32 %v2036_v35, %v4307_v36 }
 0x257   : > { %3195 = vst [vmem:[%s4444_s28 + $0x78] sm:$0x3f] %v3167_v38  ;;  %v3076_v29 = vadd.f32 %v4416_v56, %v2988_v49  ;;  %v2951_v50 = vpop.f32.mrf.mxu0 }
 0x258   : > { %v2335_v23 = vpop.f32.mrf.mxu2 }
 0x259   : > { %v3104_v18 = vmax.f32 %v3076_v29, 0.0  ;;  %v2385_v16 = vadd.f32 %v2335_v23, %v2083_v6 }
 0x25a   : > { %v2637_v39 = vpop.f32.mrf.mxu3 }
 0x25b   : > { %v3136_v17 = vmul.f32 %v4428_v48, %v3104_v18  ;;  %v2687_v7 = vadd.f32 %v2637_v39, %v2385_v16  ;;  %v2039_v37 = vpop.f32.mrf.mxu1 }
 0x25c   : > { %v2085_v11 = vadd.f32 %v2039_v37, %v4318_v61 }
 0x25d   : > { %v3168_v0 = vadd.f32 %v4438_v22, %v3136_v17  ;;  %v2989_v43 = vadd.f32 %v2939_v4, %v2687_v7 }
 0x25f   : > { %3196 = vst [vmem:[%s4444_s28 + $0x80] sm:$0xff] %v3168_v0  ;;  %v3077_v54 = vadd.f32 %v4416_v56, %v2989_v43  ;;  %v2954_v51 = vpop.f32.mrf.mxu0 }
 0x260   : > { %v2338_v31 = vpop.f32.mrf.mxu2 }
 0x261   : > { %v3105_v45 = vmax.f32 %v3077_v54, 0.0  ;;  %v2386_v3 = vadd.f32 %v2338_v31, %v2084_v14 }
 0x262   : > { %v2640_v55 = vpop.f32.mrf.mxu3 }
 0x263   : > { %v3137_v53 = vmul.f32 %v4428_v48, %v3105_v45  ;;  %v2688_v60 = vadd.f32 %v2640_v55, %v2386_v3  ;;  %v2042_v26 = vpop.f32.mrf.mxu1 }
 0x264   : > { %v2086_v59 = vadd.f32 %v2042_v26, %v4329_v44 }
 0x265   : > { %v3169_v33 = vadd.f32 %v4438_v22, %v3137_v53  ;;  %v2990_v41 = vadd.f32 %v2942_v9, %v2688_v60 }
 0x267   : > { %3197 = vst [vmem:[%s4444_s28 + $0x88] sm:$0x3f] %v3169_v33  ;;  %v3078_v36 = vadd.f32 %v4416_v56, %v2990_v41  ;;  %v2957_v0 = vpop.f32.mrf.mxu0 }
 0x268   : > { %v2341_v5 = vpop.f32.mrf.mxu2 }
 0x269   : > { %v3106_v34 = vmax.f32 %v3078_v36, 0.0  ;;  %v2387_v4 = vadd.f32 %v2341_v5, %v2085_v11 }
 0x26a   : > { %v2643_v19 = vpop.f32.mrf.mxu3 }
 0x26b   : > { %v3138_v40 = vmul.f32 %v4428_v48, %v3106_v34  ;;  %v2689_v46 = vadd.f32 %v2643_v19, %v2387_v4  ;;  %v2045_v28 = vpop.f32.mrf.mxu1 }
 0x26c   : > { %v2087_v57 = vadd.f32 %v2045_v28, %v4339_v13 }
 0x26d   : > { %v3170_v1 = vadd.f32 %v4438_v22, %v3138_v40  ;;  %v2991_v27 = vadd.f32 %v2945_v20, %v2689_v46 }
 0x26f   : > { %3198 = vst [vmem:[%s4444_s28 + $0x90] sm:$0xff] %v3170_v1  ;;  %v3079_v61 = vadd.f32 %v4416_v56, %v2991_v27  ;;  %v2960_v41 = vpop.f32.mrf.mxu0 }
 0x270   : > { %v2344_v10 = vpop.f32.mrf.mxu2 }
 0x271   : > { %v3107_v8 = vmax.f32 %v3079_v61, 0.0  ;;  %v2388_v32 = vadd.f32 %v2344_v10, %v2086_v59 }
 0x272   : > { %v2646_v30 = vpop.f32.mrf.mxu3 }
 0x273   : > { %v3139_v25 = vmul.f32 %v4428_v48, %v3107_v8  ;;  %v2690_v42 = vadd.f32 %v2646_v30, %v2388_v32  ;;  %v2048_v9 = vpop.f32.mrf.mxu1 }
 0x274   : > { %v2088_v39 = vadd.f32 %v2048_v9, %v4349_v2 }
 0x275   : > { %v3171_v12 = vadd.f32 %v4438_v22, %v3139_v25  ;;  %v2992_v52 = vadd.f32 %v2948_v58, %v2690_v42 }
 0x277   : > { %3199 = vst [vmem:[%s4444_s28 + $0x98] sm:$0x3f] %v3171_v12  ;;  %v3080_v44 = vadd.f32 %v4416_v56, %v2992_v52  ;;  %v2963_v59 = vpop.f32.mrf.mxu0 }
 0x278   : > { %v2347_v47 = vpop.f32.mrf.mxu2 }
 0x279   : > { %v3108_v35 = vmax.f32 %v3080_v44, 0.0  ;;  %v2389_v38 = vadd.f32 %v2347_v47, %v2087_v57 }
 0x27a   : > { %v2649_v49 = vpop.f32.mrf.mxu3 }
 0x27b   : > { %v3140_v6 = vmul.f32 %v4428_v48, %v3108_v35  ;;  %v2691_v29 = vadd.f32 %v2649_v49, %v2389_v38  ;;  %v2051_v23 = vpop.f32.mrf.mxu1 }
 0x27c   : > { %v2089_v3 = vadd.f32 %v2051_v23, %v4359_v63 }
 0x27d   : > { %v3172_v18 = vadd.f32 %v4438_v22, %v3140_v6  ;;  %v2993_v16 = vadd.f32 %v2951_v50, %v2691_v29 }
 0x27f   : > { %3200 = vst [vmem:[%s4444_s28 + $0xa0] sm:$0xff] %v3172_v18  ;;  %v3081_v13 = vadd.f32 %v4416_v56, %v2993_v16  ;;  %v2966_v47 = vpop.f32.mrf.mxu0 }
 0x280   : > { %v2350_v20 = vpop.f32.mrf.mxu2 }
 0x281   : > { %v3109_v17 = vmax.f32 %v3081_v13, 0.0  ;;  %v2390_v7 = vadd.f32 %v2350_v20, %v2088_v39 }
 0x282   : > { %v2652_v37 = vpop.f32.mrf.mxu3 }
 0x283   : > { %v3141_v43 = vmul.f32 %v4428_v48, %v3109_v17  ;;  %v2692_v14 = vadd.f32 %v2652_v37, %v2390_v7  ;;  %v2054_v45 = vpop.f32.mrf.mxu1 }
 0x284   : > { %v2090_v5 = vadd.f32 %v2054_v45, %v4369_v62 }
 0x285   : > { %v3173_v54 = vadd.f32 %v4438_v22, %v3141_v43  ;;  %v2994_v31 = vadd.f32 %v2954_v51, %v2692_v14 }
 0x287   : > { %3201 = vst [vmem:[%s4444_s28 + $0xa8] sm:$0x3f] %v3173_v54  ;;  %v3082_v2 = vadd.f32 %v4416_v56, %v2994_v31  ;;  %v2969_v7 = vpop.f32.mrf.mxu0 }
 0x288   : > { %v2353_v55 = vpop.f32.mrf.mxu2 }
 0x289   : > { %v3110_v53 = vmax.f32 %v3082_v2, 0.0  ;;  %v2391_v60 = vadd.f32 %v2353_v55, %v2089_v3 }
 0x28a   : > { %v2655_v26 = vpop.f32.mrf.mxu3 }
 0x28b   : > { %v3142_v58 = vmul.f32 %v4428_v48, %v3110_v53  ;;  %v2693_v33 = vadd.f32 %v2655_v26, %v2391_v60  ;;  %v2057_v34 = vpop.f32.mrf.mxu1 }
 0x28c   : > { %v2091_v61 = vadd.f32 %v2057_v34, %v4379_v24 }
 0x28d   : > { %v3174_v11 = vadd.f32 %v4438_v22, %v3142_v58  ;;  %v2995_v36 = vadd.f32 %v2957_v0, %v2693_v33 }
 0x28f   : > { %3202 = vst [vmem:[%s4444_s28 + $0xb0] sm:$0xff] %v3174_v11  ;;  %v3083_v63 = vadd.f32 %v4416_v56, %v2995_v36 }
 0x290   : > { %v2356_v4 = vpop.f32.mrf.mxu2 }
 0x291   : > { %v3111_v19 = vmax.f32 %v3083_v63, 0.0  ;;  %v2392_v40 = vadd.f32 %v2356_v4, %v2090_v5 }
 0x292   : > { %v2658_v46 = vpop.f32.mrf.mxu3 }
 0x293   : > { %v3143_v28 = vmul.f32 %v4428_v48, %v3111_v19  ;;  %v2694_v1 = vadd.f32 %v2658_v46, %v2392_v40  ;;  %v2060_v30 = vpop.f32.mrf.mxu1 }
 0x294   : > { %v2092_v57 = vadd.f32 %v2060_v30, %v4391_v21 }
 0x295   : > { %v3175_v27 = vadd.f32 %v4438_v22, %v3143_v28  ;;  %v2996_v50 = vadd.f32 %v2960_v41, %v2694_v1 }
 0x297   : > { %3203 = vst [vmem:[%s4444_s28 + $0xb8] sm:$0x3f] %v3175_v27  ;;  %v3084_v62 = vadd.f32 %v4416_v56, %v2996_v50 }
 0x298   : > { %v2359_v10 = vpop.f32.mrf.mxu2 }
 0x299   : > { %v3112_v8 = vmax.f32 %v3084_v62, 0.0  ;;  %v2393_v32 = vadd.f32 %v2359_v10, %v2091_v61 }
 0x29a   : > { %v2661_v25 = vpop.f32.mrf.mxu3 }
 0x29b   : > { %v3144_v42 = vmul.f32 %v4428_v48, %v3112_v8  ;;  %v2695_v9 = vadd.f32 %v2661_v25, %v2393_v32  ;;  %v2063_v29 = vpop.f32.mrf.mxu1 }
 0x29c   : > { %v2093_v16 = vadd.f32 %v2063_v29, %v4403_v15 }
 0x29d   : > { %v3176_v12 = vadd.f32 %v4438_v22, %v3144_v42  ;;  %v2997_v52 = vadd.f32 %v2963_v59, %v2695_v9 }
 0x29f   : > { %3204 = vst [vmem:[%s4444_s28 + $0xc0] sm:$0xff] %v3176_v12  ;;  %v3085_v24 = vadd.f32 %v4416_v56, %v2997_v52 }
 0x2a0   : > { %v2362_v44 = vpop.f32.mrf.mxu2 }
 0x2a1   : > { %v3113_v51 = vmax.f32 %v3085_v24, 0.0  ;;  %v2394_v35 = vadd.f32 %v2362_v44, %v2092_v57 }
 0x2a2   : > { %v2664_v38 = vpop.f32.mrf.mxu3 }
 0x2a3   : > { %v3145_v49 = vmul.f32 %v4428_v48, %v3113_v51  ;;  %v2696_v6 = vadd.f32 %v2664_v38, %v2394_v35 }
 0x2a5   : > { %v3177_v23 = vadd.f32 %v4438_v22, %v3145_v49  ;;  %v2998_v18 = vadd.f32 %v2966_v47, %v2696_v6 }
 0x2a7   : > { %3205 = vst [vmem:[%s4444_s28 + $0xc8] sm:$0x3f] %v3177_v23  ;;  %v3086_v21 = vadd.f32 %v4416_v56, %v2998_v18 }
 0x2a8   : > { %v2365_v39 = vpop.f32.mrf.mxu2 }
 0x2a9   : > { %v3114_v13 = vmax.f32 %v3086_v21, 0.0  ;;  %v2395_v20 = vadd.f32 %v2365_v39, %v2093_v16 }
 0x2aa   : > { %v2667_v17 = vpop.f32.mrf.mxu3 }
 0x2ab   : > { %v3146_v37 = vmul.f32 %v4428_v48, %v3114_v13  ;;  %v2697_v0 = vadd.f32 %v2667_v17, %v2395_v20 }
 0x2ad   : > { %v3178_v43 = vadd.f32 %v4438_v22, %v3146_v37  ;;  %v2999_v14 = vadd.f32 %v2969_v7, %v2697_v0 }
 0x2af   : > { %3206 = vst [vmem:[%s4444_s28 + $0xd0] sm:$0xff] %v3178_v43  ;;  %v3087_v54 = vadd.f32 %v4416_v56, %v2999_v14 }
 0x2b1   : > { %v3115_v31 = vmax.f32 %v3087_v54, 0.0 }
 0x2b3   : > { %v3147_v15 = vmul.f32 %v4428_v48, %v3115_v31 }
 0x2b5   : > { %v3179_v45 = vadd.f32 %v4438_v22, %v3147_v15 }
 0x2b7   : > { %3207 = vst [vmem:[%s4444_s28 + $0xd8] sm:$0x3f] %v3179_v45 }
 0x2b8 PF: > { %s15_s18 = sadd.s32 1, %s3572_s18  }
 0x2b9   : > { %p12_p4 = scmp.ge.s32.totalorder %s15_s18, 4  }
 0x2bb   :  { %14 = sbr.rel (!%p12_p4) target bundleno = 1 (0x1), region = 85 }

</bundles_post_ra>
